<compile_context>
chip_gen: v7x
topology: tpu7x:2x2x1
jax: 0.10.0
libtpu: 0.0.40
codegen_flags: <defaults>
</compile_context>

<pallas_src>
import math
import functools

import jax
import jax.numpy as jnp
from jax.experimental import pallas as pl
from jax.experimental.pallas import tpu as pltpu

SEQ_IN = 1000
KSIZE = 26
CONV_LEN = SEQ_IN - KSIZE + 1      # 975
POOL = 13
SEQ = CONV_LEN // POOL             # 75
NBASES = 4
KC = KSIZE * NBASES                # 104
KC_PAD = 128                       # zero-padded contraction dim (lane-dense)
LN_EPS = 1e-5
BN_EPS = 1e-5
VMEM_LIMIT = 32 << 20


# ---------------- Conv1d (im2col) + BatchNorm(eval) + ReLU + MaxPool(13) + PosEnc ----------------
def conv_bn_pool_kernel(x_ref, w_ref, scale_ref, shift_ref, pe_ref, o_ref, buf_ref):
    # one (975, 128) @ (128, d) matmul covers the whole conv for this sample
    acc = jnp.dot(x_ref[0], w_ref[...], preferred_element_type=jnp.float32)  # (975, d)
    # eval-mode batchnorm folded into scale/shift, then relu
    acc = jnp.maximum(acc * scale_ref[...] + shift_ref[...], 0.0)
    buf_ref[...] = acc                                     # (975, d) scratch
    # maxpool(kernel=13, stride=13) via strided reads of the scratch
    pooled = buf_ref[pl.ds(0, SEQ, stride=POOL), :]
    for r in range(1, POOL):
        pooled = jnp.maximum(pooled, buf_ref[pl.ds(r, SEQ, stride=POOL), :])
    o_ref[0] = (pooled + pe_ref[...]).astype(o_ref.dtype)  # add positional encoding


def conv_bn_pool(patches, w_mat, bn_scale, bn_shift, pe):
    n = patches.shape[0]
    d = w_mat.shape[1]
    return pl.pallas_call(
        conv_bn_pool_kernel,
        out_shape=jax.ShapeDtypeStruct((n, SEQ, d), jnp.float32),
        grid=(n,),
        in_specs=[
            pl.BlockSpec((1, CONV_LEN, KC_PAD), lambda i: (i, 0, 0)),
            pl.BlockSpec((KC_PAD, d), lambda i: (0, 0)),
            pl.BlockSpec((1, d), lambda i: (0, 0)),
            pl.BlockSpec((1, d), lambda i: (0, 0)),
            pl.BlockSpec((SEQ, d), lambda i: (0, 0)),
        ],
        out_specs=pl.BlockSpec((1, SEQ, d), lambda i: (i, 0, 0)),
        scratch_shapes=[pltpu.VMEM((CONV_LEN, d), jnp.float32)],
        compiler_params=pltpu.CompilerParams(
            dimension_semantics=("parallel",), vmem_limit_bytes=VMEM_LIMIT),
    )(patches, w_mat, bn_scale, bn_shift, pe)


def make_conv_patches(x_nlc):
    """im2col in the wrapper: (N, 1000, 4) -> (N, 975, 128), patch[n,t,k*4+c]=x[n,t+k,c]."""
    cols = [x_nlc[:, k:k + CONV_LEN, :] for k in range(KSIZE)]
    patches = jnp.concatenate(cols, axis=-1)                       # (N, 975, 104)
    pad = jnp.zeros((x_nlc.shape[0], CONV_LEN, KC_PAD - KC), jnp.float32)
    return jnp.concatenate([patches, pad], axis=-1)                # (N, 975, 128)


# ---------------- fused TransformerEncoder stack (post-norm, relu) ----------------
_ENC_KEYS = ("wqkv", "bqkv", "wo", "bo", "g1", "beta1",
             "w1", "b1", "w2", "b2", "g2", "beta2")
_ENC_BF16 = {"wqkv", "wo", "w1", "w2"}


def encoder_stack_kernel(x_ref, wqkv_ref, bqkv_ref, wo_ref, bo_ref,
                         g1_ref, beta1_ref, w1_ref, b1_ref, w2_ref, b2_ref,
                         g2_ref, beta2_ref, o_ref, act_ref, *, nhead):
    layer = pl.program_id(1)

    @pl.when(layer == 0)
    def _():
        act_ref[...] = x_ref[0].astype(jnp.float32)

    x = act_ref[...]                                       # (S, d) f32, VMEM-resident
    d = x.shape[-1]
    hd = d // nhead
    scale = 1.0 / math.sqrt(hd)

    # self-attention (bf16 MXU operands, f32 accumulate / f32 softmax)
    qkv = jnp.dot(x.astype(jnp.bfloat16), wqkv_ref[0],
                  preferred_element_type=jnp.float32) + bqkv_ref[0]
    q = qkv[:, :d] * scale                                 # scale hoisted out of head loop
    k = qkv[:, d:2 * d]
    v = qkv[:, 2 * d:]

    ctx_heads = []
    for h in range(nhead):
        sl = slice(h * hd, (h + 1) * hd)
        qh = q[:, sl].astype(jnp.bfloat16)
        kh = k[:, sl].astype(jnp.bfloat16)
        s = jax.lax.dot_general(qh, kh, (((1,), (1,)), ((), ())),
                                preferred_element_type=jnp.float32)      # (S, S)
        s = s - jnp.max(s, axis=-1, keepdims=True)
        p = jnp.exp(s)
        p = p * pl.reciprocal(jnp.sum(p, axis=-1, keepdims=True), approx=True)
        ctx_heads.append(jnp.dot(p.astype(jnp.bfloat16), v[:, sl].astype(jnp.bfloat16),
                                 preferred_element_type=jnp.float32))    # (S, hd)
    ctx = jnp.concatenate(ctx_heads, axis=-1)                            # (S, d)
    attn = jnp.dot(ctx.astype(jnp.bfloat16), wo_ref[0],
                   preferred_element_type=jnp.float32) + bo_ref[0]

    def layer_norm(t, g, b):
        mu = jnp.mean(t, axis=-1, keepdims=True)
        var = jnp.mean((t - mu) ** 2, axis=-1, keepdims=True)
        return (t - mu) * jax.lax.rsqrt(var + LN_EPS) * g + b

    y = layer_norm(x + attn, g1_ref[0], beta1_ref[0])
    h1 = jnp.maximum(jnp.dot(y.astype(jnp.bfloat16), w1_ref[0],
                             preferred_element_type=jnp.float32) + b1_ref[0], 0.0)
    z = jnp.dot(h1.astype(jnp.bfloat16), w2_ref[0],
                preferred_element_type=jnp.float32) + b2_ref[0]
    out = layer_norm(y + z, g2_ref[0], beta2_ref[0])

    act_ref[...] = out                                     # stays resident for next layer

    @pl.when(layer == pl.num_programs(1) - 1)
    def _():
        o_ref[0] = out.astype(o_ref.dtype)


def encoder_stack(x, enc, nhead):
    n, s, d = x.shape
    nlayer = enc["wqkv"].shape[0]
    in_specs = [pl.BlockSpec((1, s, d), lambda b, l: (b, 0, 0))]
    for kname in _ENC_KEYS:
        shp = enc[kname].shape                       # (nlayer, a, b)
        in_specs.append(pl.BlockSpec((1,) + tuple(shp[1:]), lambda b, l: (l, 0, 0)))
    return pl.pallas_call(
        functools.partial(encoder_stack_kernel, nhead=nhead),
        out_shape=jax.ShapeDtypeStruct((n, s, d), jnp.float32),
        grid=(n, nlayer),
        in_specs=in_specs,
        out_specs=pl.BlockSpec((1, s, d), lambda b, l: (b, 0, 0)),
        scratch_shapes=[pltpu.VMEM((s, d), jnp.float32)],
        compiler_params=pltpu.CompilerParams(
            dimension_semantics=("parallel", "arbitrary"),
            vmem_limit_bytes=VMEM_LIMIT),
    )(x, *[enc[kname] for kname in _ENC_KEYS])


# ---------------- fcnn: Linear(d*75, 925->1024) -> ReLU -> Linear(1024, nlabel_pad) ----------------
def fcnn_kernel(x_ref, w1_ref, b1_ref, w2_ref, o_ref, acc_ref):
    k = pl.program_id(1)

    @pl.when(k == 0)
    def _():
        acc_ref[...] = jnp.zeros_like(acc_ref)

    acc_ref[...] += jnp.dot(x_ref[...].astype(jnp.bfloat16), w1_ref[...],
                            preferred_element_type=jnp.float32)

    @pl.when(k == pl.num_programs(1) - 1)
    def _():
        h = jnp.maximum(acc_ref[...] + b1_ref[...], 0.0)
        o_ref[0] = jnp.dot(h.astype(jnp.bfloat16), w2_ref[...],
                           preferred_element_type=jnp.float32).astype(o_ref.dtype)


def fcnn(x_flat, w1, b1, w2, b2, nlabel, *, tk):
    n, kdim = x_flat.shape
    hidden_pad = w1.shape[1]
    nlabel_pad = w2.shape[1]
    half = hidden_pad // 2
    assert kdim % tk == 0 and tk % 128 == 0 and hidden_pad % 256 == 0
    nk = kdim // tk
    # two hidden-column groups on a leading "parallel" axis (v7x 2nd core); exact split
    # because ReLU is elementwise over hidden and fc2 contracts over hidden.
    partial = pl.pallas_call(
        fcnn_kernel,
        out_shape=jax.ShapeDtypeStruct((2, n, nlabel_pad), jnp.float32),
        grid=(2, nk),
        in_specs=[
            pl.BlockSpec((n, tk), lambda g, k: (0, k)),
            pl.BlockSpec((tk, half), lambda g, k: (k, g)),
            pl.BlockSpec((1, half), lambda g, k: (0, g)),
            pl.BlockSpec((half, nlabel_pad), lambda g, k: (g, 0)),
        ],
        out_specs=pl.BlockSpec((1, n, nlabel_pad), lambda g, k: (g, 0, 0)),
        scratch_shapes=[pltpu.VMEM((n, half), jnp.float32)],
        compiler_params=pltpu.CompilerParams(
            dimension_semantics=("parallel", "arbitrary"),
            vmem_limit_bytes=VMEM_LIMIT),
    )(x_flat, w1, b1, w2)
    logits = partial[0] + partial[1]
    return logits[:, :nlabel] + b2                      # slice off lane padding, add fc2 bias


# ---------------- parameters (deterministic, synthetic) ----------------
def init_params(key, d_model, dim_ff, nlayer, nlabel):
    keys = iter(jax.random.split(key, 128))

    def rnd(shape, scale=0.05):
        return jax.random.normal(next(keys), shape, jnp.float32) * scale

    params = {}
    # Conv1d weight (PyTorch layout (d_model, 4, 26)) -> matmul layout (26*4, d_model), zero-padded to 128 rows
    conv_w = rnd((d_model, NBASES, KSIZE))
    w_mat = jnp.transpose(conv_w, (2, 1, 0)).reshape(KC, d_model)
    params["conv_w_mat"] = jnp.pad(w_mat, ((0, KC_PAD - KC), (0, 0)))
    # BatchNorm1d eval: fold gamma/beta/running stats into scale/shift
    gamma = 1.0 + rnd((d_model,))
    beta = rnd((d_model,))
    mean = rnd((d_model,))
    var = 1.0 + jnp.abs(rnd((d_model,)))
    bn_scale = gamma / jnp.sqrt(var + BN_EPS)
    params["bn_scale"] = bn_scale.reshape(1, d_model)
    params["bn_shift"] = (beta - mean * bn_scale).reshape(1, d_model)
    # Positional encoding (sin/cos, max_len >= 75)
    pos = jnp.arange(SEQ, dtype=jnp.float32)[:, None]
    div = jnp.exp(jnp.arange(0, d_model, 2, dtype=jnp.float32) * (-math.log(10000.0) / d_model))
    pe = jnp.zeros((SEQ, d_model), jnp.float32)
    pe = pe.at[:, 0::2].set(jnp.sin(pos * div))
    pe = pe.at[:, 1::2].set(jnp.cos(pos * div))
    params["pe"] = pe
    # Transformer encoder layers, stacked along a leading layer axis (x @ W layout)
    per_layer = {kname: [] for kname in _ENC_KEYS}
    for _ in range(nlayer):
        per_layer["wqkv"].append(rnd((d_model, 3 * d_model)))
        per_layer["bqkv"].append(rnd((1, 3 * d_model)))
        per_layer["wo"].append(rnd((d_model, d_model)))
        per_layer["bo"].append(rnd((1, d_model)))
        per_layer["g1"].append(jnp.ones((1, d_model), jnp.float32))
        per_layer["beta1"].append(jnp.zeros((1, d_model), jnp.float32))
        per_layer["w1"].append(rnd((d_model, dim_ff)))
        per_layer["b1"].append(rnd((1, dim_ff)))
        per_layer["w2"].append(rnd((dim_ff, d_model)))
        per_layer["b2"].append(rnd((1, d_model)))
        per_layer["g2"].append(jnp.ones((1, d_model), jnp.float32))
        per_layer["beta2"].append(jnp.zeros((1, d_model), jnp.float32))
    enc = {}
    for kname, vals in per_layer.items():
        arr = jnp.stack(vals)
        if kname in _ENC_BF16:
            arr = arr.astype(jnp.bfloat16)     # bf16 matmul weights, f32 biases / LN params
        enc[kname] = arr
    params["enc"] = enc
    # fcnn: Linear(d_model*75, 925) -> ReLU -> Linear(925, nlabel); padded lane-dense + bf16
    hidden = 925
    hidden_pad = 1024
    nlabel_pad = ((nlabel + 127) // 128) * 128
    fc1_w = rnd((d_model * SEQ, hidden), scale=0.01)      # rows indexed PyTorch-style: e*75 + s
    fc1_b = rnd((1, hidden))
    fc2_w = rnd((hidden, nlabel))
    fc2_b = rnd((1, nlabel))
    # One-time row permutation so the kernel contracts against the PLAIN (N, 75*d) reshape
    # of the encoder output (row s*d + e) instead of the channel-major flatten — removes a
    # per-forward activation transpose (weight-side hoist, zero runtime cost).
    perm = (jnp.arange(SEQ)[:, None] + jnp.arange(d_model)[None, :] * SEQ).reshape(-1)
    fc1_w = fc1_w[perm]
    params["fc1_w"] = jnp.pad(fc1_w, ((0, 0), (0, hidden_pad - hidden))).astype(jnp.bfloat16)
    params["fc1_b"] = jnp.pad(fc1_b, ((0, 0), (0, hidden_pad - hidden)))
    params["fc2_w"] = jnp.pad(fc2_w, ((0, hidden_pad - hidden),
                                      (0, nlabel_pad - nlabel))).astype(jnp.bfloat16)
    params["fc2_b"] = fc2_b
    params["nlabel"] = nlabel
    return params


# ---------------- full forward ----------------
def neural_sea_forward(x, params, *, nhead, fc_tk):
    assert x.ndim == 3 and x.shape[1] == NBASES and x.shape[2] == SEQ_IN
    n = x.shape[0]
    d = params["conv_w_mat"].shape[1]
    x_nlc = jnp.transpose(x, (0, 2, 1)).astype(jnp.float32)            # NCW -> NLC
    patches = make_conv_patches(x_nlc)                                 # (N, 975, 128) im2col
    h = conv_bn_pool(patches, params["conv_w_mat"], params["bn_scale"],
                     params["bn_shift"], params["pe"])                 # (N, 75, d)
    h = encoder_stack(h, params["enc"], nhead)                         # fused nlayer stack
    # PyTorch flatten flat[n, e*75+s] is absorbed into fc1_w's row permutation at init,
    # so a plain reshape (flat[n, s*d+e]) is sufficient here (no activation transpose).
    h_flat = h.reshape(n, SEQ * d)
    return fcnn(h_flat, params["fc1_w"], params["fc1_b"],
                params["fc2_w"], params["fc2_b"], params["nlabel"], tk=fc_tk)


if __name__ == "__main__":
    # Small but forward-consistent config: input length/channels fixed by the module's assert.
    D_MODEL, NHEAD, DIM_FF, NLAYER, NLABEL = 128, 4, 256, 2, 64
    BATCH = 2
    FC_TK = 3200                    # divides d_model*75 = 9600, multiple of 128

    key = jax.random.PRNGKey(0)
    pkey, xkey = jax.random.split(key)
    params = init_params(pkey, D_MODEL, DIM_FF, NLAYER, NLABEL)
    x = jax.random.normal(xkey, (BATCH, NBASES, SEQ_IN), jnp.float32)

    out = neural_sea_forward(x, params, nhead=NHEAD, fc_tk=FC_TK)
    out = jax.block_until_ready(out)
    assert out.shape == (BATCH, NLABEL) and jnp.all(jnp.isfinite(out))
    print("KERNEL_OK")
</pallas_src>

<mosaic_0001>
module attributes {stable_mosaic.version = 11 : i64} {
  func.func @conv_bn_pool_kernel(%arg0: i32, %arg1: memref<1x975x128xf32, #tpu.memory_space<vmem>>, %arg2: memref<128x128xf32, #tpu.memory_space<vmem>>, %arg3: memref<1x128xf32, #tpu.memory_space<vmem>>, %arg4: memref<1x128xf32, #tpu.memory_space<vmem>>, %arg5: memref<75x128xf32, #tpu.memory_space<vmem>>, %arg6: memref<1x75x128xf32, #tpu.memory_space<vmem>>, %arg7: memref<975x128xf32, #tpu.memory_space<vmem>>) attributes {dimension_semantics = [#tpu.dimension_semantics<parallel>], iteration_bounds = array<i64: 2>, scalar_prefetch = 0 : i64, scratch_operands = 1 : i64, tpu.core_type = #tpu.core_type<tc>, window_params = [{transform_indices = @transform_0, window_bounds = array<i64: 1, 975, 128>}, {pipeline_mode = #tpu.pipeline_mode<synchronous>, transform_indices = @transform_1, window_bounds = array<i64: 128, 128>}, {pipeline_mode = #tpu.pipeline_mode<synchronous>, transform_indices = @transform_2, window_bounds = array<i64: 1, 128>}, {pipeline_mode = #tpu.pipeline_mode<synchronous>, transform_indices = @transform_3, window_bounds = array<i64: 1, 128>}, {pipeline_mode = #tpu.pipeline_mode<synchronous>, transform_indices = @transform_4, window_bounds = array<i64: 75, 128>}, {transform_indices = @transform_5, window_bounds = array<i64: 1, 75, 128>}]} {
    %c0 = arith.constant 0 : index
    %c0_0 = arith.constant 0 : index
    %c0_1 = arith.constant 0 : index
    %0 = vector.load %arg1[%c0, %c0_0, %c0_1] : memref<1x975x128xf32, #tpu.memory_space<vmem>>, vector<1x975x128xf32>
    %1 = vector.shape_cast %0 : vector<1x975x128xf32> to vector<975x128xf32>
    %c0_2 = arith.constant 0 : index
    %c0_3 = arith.constant 0 : index
    %2 = vector.load %arg2[%c0_2, %c0_3] : memref<128x128xf32, #tpu.memory_space<vmem>>, vector<128x128xf32>
    %cst = arith.constant dense<0.000000e+00> : vector<975x128xf32>
    %3 = tpu.matmul %1, %2, %cst {dimension_numbers = #tpu.dot_dimension_numbers<[1], [0], [0], [1], [0, 0, 1, 1], [], []>} : vector<975x128xf32>, vector<128x128xf32>, vector<975x128xf32> -> vector<975x128xf32>
    %c0_4 = arith.constant 0 : index
    %c0_5 = arith.constant 0 : index
    %4 = vector.load %arg3[%c0_4, %c0_5] : memref<1x128xf32, #tpu.memory_space<vmem>>, vector<1x128xf32>
    %5 = vector.broadcast %4 : vector<1x128xf32> to vector<975x128xf32>
    %6 = arith.mulf %3, %5 : vector<975x128xf32>
    %c0_6 = arith.constant 0 : index
    %c0_7 = arith.constant 0 : index
    %7 = vector.load %arg4[%c0_6, %c0_7] : memref<1x128xf32, #tpu.memory_space<vmem>>, vector<1x128xf32>
    %8 = vector.broadcast %7 : vector<1x128xf32> to vector<975x128xf32>
    %9 = arith.addf %6, %8 : vector<975x128xf32>
    %cst_8 = arith.constant 0.000000e+00 : f32
    %10 = vector.broadcast %cst_8 : f32 to vector<975x128xf32>
    %11 = arith.maximumf %9, %10 : vector<975x128xf32>
    %c0_9 = arith.constant 0 : index
    %c0_10 = arith.constant 0 : index
    %12 = vector.load %arg7[%c0_9, %c0_10] : memref<975x128xf32, #tpu.memory_space<vmem>>, vector<975x128xf32>
    tpu.vector_store %arg7[%c0_9, %c0_10], %11 {strides = array<i32>} : memref<975x128xf32, #tpu.memory_space<vmem>>, vector<975x128xf32>,
    %c0_11 = arith.constant 0 : index
    %c0_12 = arith.constant 0 : index
    %13 = tpu.strided_load %arg7[%c0_11, %c0_12] {strides = array<i32: 13, 1>} : memref<975x128xf32, #tpu.memory_space<vmem>>, vector<75x128xf32>
    %c1 = arith.constant 1 : index
    %c0_13 = arith.constant 0 : index
    %14 = tpu.strided_load %arg7[%c1, %c0_13] {strides = array<i32: 13, 1>} : memref<975x128xf32, #tpu.memory_space<vmem>>, vector<75x128xf32>
    %15 = arith.maximumf %13, %14 : vector<75x128xf32>
    %c2 = arith.constant 2 : index
    %c0_14 = arith.constant 0 : index
    %16 = tpu.strided_load %arg7[%c2, %c0_14] {strides = array<i32: 13, 1>} : memref<975x128xf32, #tpu.memory_space<vmem>>, vector<75x128xf32>
    %17 = arith.maximumf %15, %16 : vector<75x128xf32>
    %c3 = arith.constant 3 : index
    %c0_15 = arith.constant 0 : index
    %18 = tpu.strided_load %arg7[%c3, %c0_15] {strides = array<i32: 13, 1>} : memref<975x128xf32, #tpu.memory_space<vmem>>, vector<75x128xf32>
    %19 = arith.maximumf %17, %18 : vector<75x128xf32>
    %c4 = arith.constant 4 : index
    %c0_16 = arith.constant 0 : index
    %20 = tpu.strided_load %arg7[%c4, %c0_16] {strides = array<i32: 13, 1>} : memref<975x128xf32, #tpu.memory_space<vmem>>, vector<75x128xf32>
    %21 = arith.maximumf %19, %20 : vector<75x128xf32>
    %c5 = arith.constant 5 : index
    %c0_17 = arith.constant 0 : index
    %22 = tpu.strided_load %arg7[%c5, %c0_17] {strides = array<i32: 13, 1>} : memref<975x128xf32, #tpu.memory_space<vmem>>, vector<75x128xf32>
    %23 = arith.maximumf %21, %22 : vector<75x128xf32>
    %c6 = arith.constant 6 : index
    %c0_18 = arith.constant 0 : index
    %24 = tpu.strided_load %arg7[%c6, %c0_18] {strides = array<i32: 13, 1>} : memref<975x128xf32, #tpu.memory_space<vmem>>, vector<75x128xf32>
    %25 = arith.maximumf %23, %24 : vector<75x128xf32>
    %c7 = arith.constant 7 : index
    %c0_19 = arith.constant 0 : index
    %26 = tpu.strided_load %arg7[%c7, %c0_19] {strides = array<i32: 13, 1>} : memref<975x128xf32, #tpu.memory_space<vmem>>, vector<75x128xf32>
    %27 = arith.maximumf %25, %26 : vector<75x128xf32>
    %c8 = arith.constant 8 : index
    %c0_20 = arith.constant 0 : index
    %28 = tpu.strided_load %arg7[%c8, %c0_20] {strides = array<i32: 13, 1>} : memref<975x128xf32, #tpu.memory_space<vmem>>, vector<75x128xf32>
    %29 = arith.maximumf %27, %28 : vector<75x128xf32>
    %c9 = arith.constant 9 : index
    %c0_21 = arith.constant 0 : index
    %30 = tpu.strided_load %arg7[%c9, %c0_21] {strides = array<i32: 13, 1>} : memref<975x128xf32, #tpu.memory_space<vmem>>, vector<75x128xf32>
    %31 = arith.maximumf %29, %30 : vector<75x128xf32>
    %c10 = arith.constant 10 : index
    %c0_22 = arith.constant 0 : index
    %32 = tpu.strided_load %arg7[%c10, %c0_22] {strides = array<i32: 13, 1>} : memref<975x128xf32, #tpu.memory_space<vmem>>, vector<75x128xf32>
    %33 = arith.maximumf %31, %32 : vector<75x128xf32>
    %c11 = arith.constant 11 : index
    %c0_23 = arith.constant 0 : index
    %34 = tpu.strided_load %arg7[%c11, %c0_23] {strides = array<i32: 13, 1>} : memref<975x128xf32, #tpu.memory_space<vmem>>, vector<75x128xf32>
    %35 = arith.maximumf %33, %34 : vector<75x128xf32>
    %c12 = arith.constant 12 : index
    %c0_24 = arith.constant 0 : index
    %36 = tpu.strided_load %arg7[%c12, %c0_24] {strides = array<i32: 13, 1>} : memref<975x128xf32, #tpu.memory_space<vmem>>, vector<75x128xf32>
    %37 = arith.maximumf %35, %36 : vector<75x128xf32>
    %c0_25 = arith.constant 0 : index
    %c0_26 = arith.constant 0 : index
    %38 = vector.load %arg5[%c0_25, %c0_26] : memref<75x128xf32, #tpu.memory_space<vmem>>, vector<75x128xf32>
    %39 = arith.addf %37, %38 : vector<75x128xf32>
    %c0_27 = arith.constant 0 : index
    %c0_28 = arith.constant 0 : index
    %c0_29 = arith.constant 0 : index
    %40 = vector.load %arg6[%c0_27, %c0_28, %c0_29] : memref<1x75x128xf32, #tpu.memory_space<vmem>>, vector<1x75x128xf32>
    %41 = vector.shape_cast %40 : vector<1x75x128xf32> to vector<75x128xf32>
    %42 = vector.shape_cast %39 : vector<75x128xf32> to vector<1x75x128xf32>
    tpu.vector_store %arg6[%c0_27, %c0_28, %c0_29], %42 {strides = array<i32>} : memref<1x75x128xf32, #tpu.memory_space<vmem>>, vector<1x75x128xf32>,
    return
  }
  func.func @transform_0(%arg0: i32) -> (i32, i32, i32) {
    %c0_i32 = arith.constant 0 : i32
    %c0_i32_0 = arith.constant 0 : i32
    %c0_i32_1 = arith.constant 0 : i32
    return %arg0, %c0_i32, %c0_i32_0 : i32, i32, i32
  }
  func.func @transform_1(%arg0: i32) -> (i32, i32) {
    %c0_i32 = arith.constant 0 : i32
    %c0_i32_0 = arith.constant 0 : i32
    %c0_i32_1 = arith.constant 0 : i32
    return %c0_i32, %c0_i32_0 : i32, i32
  }
  func.func @transform_2(%arg0: i32) -> (i32, i32) {
    %c0_i32 = arith.constant 0 : i32
    %c0_i32_0 = arith.constant 0 : i32
    %c0_i32_1 = arith.constant 0 : i32
    return %c0_i32, %c0_i32_0 : i32, i32
  }
  func.func @transform_3(%arg0: i32) -> (i32, i32) {
    %c0_i32 = arith.constant 0 : i32
    %c0_i32_0 = arith.constant 0 : i32
    %c0_i32_1 = arith.constant 0 : i32
    return %c0_i32, %c0_i32_0 : i32, i32
  }
  func.func @transform_4(%arg0: i32) -> (i32, i32) {
    %c0_i32 = arith.constant 0 : i32
    %c0_i32_0 = arith.constant 0 : i32
    %c0_i32_1 = arith.constant 0 : i32
    return %c0_i32, %c0_i32_0 : i32, i32
  }
  func.func @transform_5(%arg0: i32) -> (i32, i32, i32) {
    %c0_i32 = arith.constant 0 : i32
    %c0_i32_0 = arith.constant 0 : i32
    %c0_i32_1 = arith.constant 0 : i32
    return %arg0, %c0_i32, %c0_i32_0 : i32, i32, i32
  }
}

</mosaic_0001>

<bundles_post_ra>
// kernel: tpu_custom_call.1
= control target key start
LH: loop header
LB: loop body
LE: loop exit
PB: predicated region body
PF: predicated region fallthrough
CT: control target
= control target key end

     0   :  { %s2466_s18 = smov 0   ;;  %s2967_s0 = inlined_call_operand.vmem [shape: f32[2,975,128], index: 0, kind: input, shape index: {}]   ;;  %s2968_s1 = inlined_call_operand.vmem [shape: f32[128,128], index: 1, kind: input, shape index: {}]   ;;  %s2969_s2 = inlined_call_operand.vmem [shape: f32[1,128], index: 2, kind: input, shape index: {}]   ;;  %s2970_s3 = inlined_call_operand.vmem [shape: f32[1,128], index: 3, kind: input, shape index: {}]   ;;  %s2971_s4 = inlined_call_operand.vmem [shape: f32[75,128], index: 4, kind: input, shape index: {}]   ;;  %s2972_s5 = inlined_call_operand.vmem [shape: f32[2,75,128], index: 5, kind: output, shape index: {}]  }
   0x1 LB: > { %s2004_s19 = sadd.s32 4294967295, %s2434_s18   ;;  %p2008_p0 = scmp.ge.s32.totalorder %s2434_s18, 1  ;;  %s2434_s18 = sphi %s2466_s18, %s15_s18  }
   0x2   : > { %p187_p1 = scmp.lt.s32.totalorder %s2434_s18, 3 }
   0x4   : > { %p188_p2 = pnand %p2008_p0, %p187_p1 }
   0x5   : > { %v347_v0 = vld [vmem:[%s2968_s1] sm:$0xff] (!%p188_p2)  ;;  %v348_v1 = vld [vmem:[%s2968_s1 + $0x8] sm:$0xff] (!%p188_p2)  ;;  %v349_v2 = vld [vmem:[%s2968_s1 + $0x10] sm:$0xff] (!%p188_p2)  ;;  %p215_p3 = scmp.lt.s32.totalorder (!%p188_p2), %s2004_s19, 1 }
   0x6   : > { %191 = sbr.rel (%p188_p2) target bundleno = 420 (0x1a4), region = 40  ;;  %v2368_v3 = vpack.c.bf16 (!%p188_p2), %v348_v1, %v347_v0  ;;  %v350_v4 = vld [vmem:[%s2968_s1 + $0x18] sm:$0xff] (!%p188_p2)  ;;  %v351_v6 = vld [vmem:[%s2968_s1 + $0x20] sm:$0xff] (!%p188_p2)  ;;  %v352_v7 = vld [vmem:[%s2968_s1 + $0x28] sm:$0xff] (!%p188_p2) }
   0x7   : > { %v2372_v5 = vpack.c.bf16 (!%p188_p2), %v350_v4, %v349_v2  ;;  %v2376_v8 = vpack.c.bf16 (!%p188_p2), %v352_v7, %v351_v6  ;;  %v353_v9 = vld [vmem:[%s2968_s1 + $0x30] sm:$0xff] (!%p188_p2)  ;;  %v354_v10 = vld [vmem:[%s2968_s1 + $0x38] sm:$0xff] (!%p188_p2)  ;;  %v355_v14 = vld [vmem:[%s2968_s1 + $0x40] sm:$0xff] (!%p188_p2) }
   0x8   : > { %2369 = vmatprep.subr.bf16.mxu0 (!%p188_p2), %v2368_v3  ;;  %2400 = vmatprep.subr.bf16.mxu1 (!%p188_p2), %v2368_v3  ;;  %v2380_v13 = vpack.c.bf16 (!%p188_p2), %v354_v10, %v353_v9  ;;  %v356_v15 = vld [vmem:[%s2968_s1 + $0x48] sm:$0xff] (!%p188_p2)  ;;  %v357_v17 = vld [vmem:[%s2968_s1 + $0x50] sm:$0xff] (!%p188_p2)  ;;  %v358_v18 = vld [vmem:[%s2968_s1 + $0x58] sm:$0xff] (!%p188_p2) }
   0x9   : > { %2371 = vmatpush3.bf16.msra.mxu0 (!%p188_p2), %v2368_v3  ;;  %2408 = vmatpush3.bf16.msra.mxu1 (!%p188_p2), %v2368_v3  ;;  %v2384_v16 = vpack.c.bf16 (!%p188_p2), %v356_v15, %v355_v14  ;;  %v2388_v19 = vpack.c.bf16 (!%p188_p2), %v358_v18, %v357_v17  ;;  %v359_v20 = vld [vmem:[%s2968_s1 + $0x60] sm:$0xff] (!%p188_p2)  ;;  %v360_v21 = vld [vmem:[%s2968_s1 + $0x68] sm:$0xff] (!%p188_p2)  ;;  %v361_v23 = vld [vmem:[%s2968_s1 + $0x70] sm:$0xff] (!%p188_p2) }
   0xa   : > { %2373 = vmatprep.subr.bf16.mxu0 (!%p188_p2), %v2372_v5  ;;  %2401 = vmatprep.subr.bf16.mxu1 (!%p188_p2), %v2372_v5  ;;  %v2392_v22 = vpack.c.bf16 (!%p188_p2), %v360_v21, %v359_v20  ;;  %v362_v24 = vld [vmem:[%s2968_s1 + $0x78] sm:$0xff] (!%p188_p2) }
   0xb   : > { %v2396_v25 = vpack.c.bf16 (!%p188_p2), %v362_v24, %v361_v23 }
   0xd   : > { %s2974_s19 = smov (!%p215_p3, %s2004_s19), 1  ;;  %2375 = vmatpush3.bf16.msra.mxu0 %v2372_v5  ;;  %2409 = vmatpush3.bf16.msra.mxu1 %v2372_v5 }
   0xe   : > { %s2416_s7 = smul.u32 976, %s2974_s19  ;;  %2377 = vmatprep.subr.bf16.mxu0 %v2376_v8  ;;  %2402 = vmatprep.subr.bf16.mxu1 %v2376_v8 }
   0xf   : > { %s2417_s12 = smul.u32 80, %s2974_s19 }
  0x10   : > { %s2504_s14 = scalar_lea.vmem %s2967_s0, %s2416_s7 }
  0x11   : > { %v225_v11 = vld [vmem:[%s2504_s14] sm:$0xff]  ;;  %v287_v12 = vld [vmem:[%s2504_s14 + $0x1f0] sm:$0xff]  ;;  %2379 = vmatpush3.bf16.msra.mxu0 %v2376_v8  ;;  %2410 = vmatpush3.bf16.msra.mxu1 %v2376_v8  ;;  %v226_v26 = vld [vmem:[%s2504_s14 + $0x8] sm:$0xff]  ;;  %s2775_s17 = scalar_lea.vmem %s2972_s5, %s2417_s12 }
  0x12   : > { %2185 = vmatprep.mubr.f32.mxu0 %v225_v11  ;;  %2278 = vmatprep.mubr.f32.mxu1 %v287_v12  ;;  %v288_v27 = vld [vmem:[%s2504_s14 + $0x1f8] sm:$0xff]  ;;  %v227_v28 = vld [vmem:[%s2504_s14 + $0x10] sm:$0xff]  ;;  %v289_v29 = vld [vmem:[%s2504_s14 + $0x200] sm:$0xff] }
  0x13   : > { %2381 = vmatprep.subr.bf16.mxu0 %v2380_v13  ;;  %2403 = vmatprep.subr.bf16.mxu1 %v2380_v13  ;;  %v228_v30 = vld [vmem:[%s2504_s14 + $0x18] sm:$0xff]  ;;  %v290_v31 = vld [vmem:[%s2504_s14 + $0x208] sm:$0xff]  ;;  %v229_v32 = vld [vmem:[%s2504_s14 + $0x20] sm:$0xff] }
  0x14   : > { %v291_v33 = vld [vmem:[%s2504_s14 + $0x210] sm:$0xff]  ;;  %v230_v34 = vld [vmem:[%s2504_s14 + $0x28] sm:$0xff]  ;;  %v292_v35 = vld [vmem:[%s2504_s14 + $0x218] sm:$0xff] }
  0x15   : > { %2383 = vmatpush3.bf16.msra.mxu0 %v2380_v13  ;;  %2411 = vmatpush3.bf16.msra.mxu1 %v2380_v13  ;;  %v231_v36 = vld [vmem:[%s2504_s14 + $0x30] sm:$0xff]  ;;  %v293_v37 = vld [vmem:[%s2504_s14 + $0x220] sm:$0xff]  ;;  %v232_v38 = vld [vmem:[%s2504_s14 + $0x38] sm:$0xff] }
  0x16   : > { %2385 = vmatprep.subr.bf16.mxu0 %v2384_v16  ;;  %2404 = vmatprep.subr.bf16.mxu1 %v2384_v16  ;;  %v294_v39 = vld [vmem:[%s2504_s14 + $0x228] sm:$0xff]  ;;  %v233_v40 = vld [vmem:[%s2504_s14 + $0x40] sm:$0xff]  ;;  %v295_v41 = vld [vmem:[%s2504_s14 + $0x230] sm:$0xff] }
  0x17   : > { %v234_v42 = vld [vmem:[%s2504_s14 + $0x48] sm:$0xff]  ;;  %v296_v43 = vld [vmem:[%s2504_s14 + $0x238] sm:$0xff]  ;;  %v235_v44 = vld [vmem:[%s2504_s14 + $0x50] sm:$0xff] }
  0x18   : > { %v297_v45 = vld [vmem:[%s2504_s14 + $0x240] sm:$0xff]  ;;  %v236_v46 = vld [vmem:[%s2504_s14 + $0x58] sm:$0xff]  ;;  %v298_v47 = vld [vmem:[%s2504_s14 + $0x248] sm:$0xff] }
  0x19   : > { %2387 = vmatpush3.bf16.msra.mxu0 %v2384_v16  ;;  %2412 = vmatpush3.bf16.msra.mxu1 %v2384_v16  ;;  %v237_v48 = vld [vmem:[%s2504_s14 + $0x60] sm:$0xff]  ;;  %v299_v49 = vld [vmem:[%s2504_s14 + $0x250] sm:$0xff]  ;;  %v238_v50 = vld [vmem:[%s2504_s14 + $0x68] sm:$0xff] }
  0x1a   : > { %2389 = vmatprep.subr.bf16.mxu0 %v2388_v19  ;;  %2405 = vmatprep.subr.bf16.mxu1 %v2388_v19  ;;  %v300_v51 = vld [vmem:[%s2504_s14 + $0x258] sm:$0xff]  ;;  %v239_v52 = vld [vmem:[%s2504_s14 + $0x70] sm:$0xff]  ;;  %v301_v53 = vld [vmem:[%s2504_s14 + $0x260] sm:$0xff] }
  0x1b   : > { %v240_v54 = vld [vmem:[%s2504_s14 + $0x78] sm:$0xff]  ;;  %v302_v55 = vld [vmem:[%s2504_s14 + $0x268] sm:$0xff]  ;;  %v241_v56 = vld [vmem:[%s2504_s14 + $0x80] sm:$0xff] }
  0x1c   : > { %v303_v57 = vld [vmem:[%s2504_s14 + $0x270] sm:$0xff]  ;;  %v242_v58 = vld [vmem:[%s2504_s14 + $0x88] sm:$0xff]  ;;  %v304_v59 = vld [vmem:[%s2504_s14 + $0x278] sm:$0xff] }
  0x1d   : > { %2391 = vmatpush3.bf16.msra.mxu0 %v2388_v19  ;;  %2413 = vmatpush3.bf16.msra.mxu1 %v2388_v19  ;;  %v243_v60 = vld [vmem:[%s2504_s14 + $0x90] sm:$0xff]  ;;  %v305_v61 = vld [vmem:[%s2504_s14 + $0x280] sm:$0xff]  ;;  %v244_v62 = vld [vmem:[%s2504_s14 + $0x98] sm:$0xff] }
  0x1e   : > { %2393 = vmatprep.subr.bf16.mxu0 %v2392_v22  ;;  %2406 = vmatprep.subr.bf16.mxu1 %v2392_v22  ;;  %v306_v63 = vld [vmem:[%s2504_s14 + $0x288] sm:$0xff]  ;;  %v245_v0 = vld [vmem:[%s2504_s14 + $0xa0] sm:$0xff]  ;;  %v307_v1 = vld [vmem:[%s2504_s14 + $0x290] sm:$0xff] }
  0x1f   : > { %v246_v2 = vld [vmem:[%s2504_s14 + $0xa8] sm:$0xff]  ;;  %v308_v3 = vld [vmem:[%s2504_s14 + $0x298] sm:$0xff]  ;;  %v247_v4 = vld [vmem:[%s2504_s14 + $0xb0] sm:$0xff] }
  0x20   : > { %v309_v5 = vld [vmem:[%s2504_s14 + $0x2a0] sm:$0xff]  ;;  %v248_v6 = vld [vmem:[%s2504_s14 + $0xb8] sm:$0xff]  ;;  %v310_v7 = vld [vmem:[%s2504_s14 + $0x2a8] sm:$0xff] }
  0x21   : > { %2395 = vmatpush3.bf16.msra.mxu0 %v2392_v22  ;;  %2414 = vmatpush3.bf16.msra.mxu1 %v2392_v22  ;;  %v249_v8 = vld [vmem:[%s2504_s14 + $0xc0] sm:$0xff]  ;;  %v311_v9 = vld [vmem:[%s2504_s14 + $0x2b0] sm:$0xff]  ;;  %v250_v10 = vld [vmem:[%s2504_s14 + $0xc8] sm:$0xff] }
  0x22   : > { %2397 = vmatprep.subr.bf16.mxu0 %v2396_v25  ;;  %2407 = vmatprep.subr.bf16.mxu1 %v2396_v25  ;;  %v312_v11 = vld [vmem:[%s2504_s14 + $0x2b8] sm:$0xff]  ;;  %v251_v12 = vld [vmem:[%s2504_s14 + $0xd0] sm:$0xff]  ;;  %v313_v13 = vld [vmem:[%s2504_s14 + $0x2c0] sm:$0xff] }
  0x23   : > { %v252_v14 = vld [vmem:[%s2504_s14 + $0xd8] sm:$0xff]  ;;  %v314_v15 = vld [vmem:[%s2504_s14 + $0x2c8] sm:$0xff]  ;;  %v253_v16 = vld [vmem:[%s2504_s14 + $0xe0] sm:$0xff] }
  0x24   : > { %v315_v17 = vld [vmem:[%s2504_s14 + $0x2d0] sm:$0xff]  ;;  %v254_v18 = vld [vmem:[%s2504_s14 + $0xe8] sm:$0xff]  ;;  %v316_v19 = vld [vmem:[%s2504_s14 + $0x2d8] sm:$0xff] }
  0x25   : > { %2399 = vmatpush3.bf16.msra.mxu0 %v2396_v25  ;;  %2415 = vmatpush3.bf16.msra.mxu1 %v2396_v25  ;;  %v255_v20 = vld [vmem:[%s2504_s14 + $0xf0] sm:$0xff]  ;;  %v317_v21 = vld [vmem:[%s2504_s14 + $0x2e0] sm:$0xff]  ;;  %v256_v22 = vld [vmem:[%s2504_s14 + $0xf8] sm:$0xff] }
  0x26   : > { %v318_v23 = vld [vmem:[%s2504_s14 + $0x2e8] sm:$0xff]  ;;  %v257_v24 = vld [vmem:[%s2504_s14 + $0x100] sm:$0xff]  ;;  %v319_v25 = vld [vmem:[%s2504_s14 + $0x2f0] sm:$0xff] }
  0x28   : > { %2186 = vmatmul.mubr.f32.vlgmr.msra.gmra.mrb[0].mxu0 %v226_v26  ;;  %2279 = vmatmul.mubr.f32.vlgmr.msra.gmra.mrb[0].mxu1 %v288_v27  ;;  %v258_v26 = vld [vmem:[%s2504_s14 + $0x108] sm:$0xff]  ;;  %v320_v27 = vld [vmem:[%s2504_s14 + $0x2f8] sm:$0xff] }
  0x29   : > { %2188 = vmatprep.mubr.f32.mxu0 %v227_v28  ;;  %2281 = vmatprep.mubr.f32.mxu1 %v289_v29  ;;  %v259_v28 = vld [vmem:[%s2504_s14 + $0x110] sm:$0xff]  ;;  %v321_v29 = vld [vmem:[%s2504_s14 + $0x300] sm:$0xff] }
  0x2c   : > { %2189 = vmatmul.mubr.f32.gmra.mrb[2].mxu0 %v228_v30  ;;  %2282 = vmatmul.mubr.f32.gmra.mrb[2].mxu1 %v290_v31  ;;  %v260_v30 = vld [vmem:[%s2504_s14 + $0x118] sm:$0xff]  ;;  %v322_v31 = vld [vmem:[%s2504_s14 + $0x308] sm:$0xff] }
  0x2d   : > { %2191 = vmatprep.mubr.f32.mxu0 %v229_v32  ;;  %2284 = vmatprep.mubr.f32.mxu1 %v291_v33  ;;  %v261_v32 = vld [vmem:[%s2504_s14 + $0x120] sm:$0xff]  ;;  %v323_v33 = vld [vmem:[%s2504_s14 + $0x310] sm:$0xff] }
  0x30   : > { %2192 = vmatmul.mubr.f32.gmra.mrb[4].mxu0 %v230_v34  ;;  %2285 = vmatmul.mubr.f32.gmra.mrb[4].mxu1 %v292_v35  ;;  %v262_v34 = vld [vmem:[%s2504_s14 + $0x128] sm:$0xff]  ;;  %v324_v35 = vld [vmem:[%s2504_s14 + $0x318] sm:$0xff] }
  0x31   : > { %2194 = vmatprep.mubr.f32.mxu0 %v231_v36  ;;  %2287 = vmatprep.mubr.f32.mxu1 %v293_v37  ;;  %v263_v36 = vld [vmem:[%s2504_s14 + $0x130] sm:$0xff]  ;;  %v325_v37 = vld [vmem:[%s2504_s14 + $0x320] sm:$0xff] }
  0x34   : > { %2195 = vmatmul.mubr.f32.gmra.mrb[6].mxu0 %v232_v38  ;;  %2288 = vmatmul.mubr.f32.gmra.mrb[6].mxu1 %v294_v39  ;;  %v264_v38 = vld [vmem:[%s2504_s14 + $0x138] sm:$0xff]  ;;  %v326_v39 = vld [vmem:[%s2504_s14 + $0x328] sm:$0xff] }
  0x35   : > { %2197 = vmatprep.mubr.f32.mxu0 %v233_v40  ;;  %2290 = vmatprep.mubr.f32.mxu1 %v295_v41  ;;  %v265_v40 = vld [vmem:[%s2504_s14 + $0x140] sm:$0xff]  ;;  %v327_v41 = vld [vmem:[%s2504_s14 + $0x330] sm:$0xff] }
  0x38   : > { %2198 = vmatmul.mubr.f32.gmra.mrb[8].mxu0 %v234_v42  ;;  %2291 = vmatmul.mubr.f32.gmra.mrb[8].mxu1 %v296_v43  ;;  %v266_v42 = vld [vmem:[%s2504_s14 + $0x148] sm:$0xff]  ;;  %v328_v43 = vld [vmem:[%s2504_s14 + $0x338] sm:$0xff] }
  0x39   : > { %2200 = vmatprep.mubr.f32.mxu0 %v235_v44  ;;  %2293 = vmatprep.mubr.f32.mxu1 %v297_v45  ;;  %v267_v44 = vld [vmem:[%s2504_s14 + $0x150] sm:$0xff]  ;;  %v329_v45 = vld [vmem:[%s2504_s14 + $0x340] sm:$0xff] }
  0x3c   : > { %2201 = vmatmul.mubr.f32.gmra.mrb[10].mxu0 %v236_v46  ;;  %2294 = vmatmul.mubr.f32.gmra.mrb[10].mxu1 %v298_v47  ;;  %v268_v46 = vld [vmem:[%s2504_s14 + $0x158] sm:$0xff]  ;;  %v330_v47 = vld [vmem:[%s2504_s14 + $0x348] sm:$0xff] }
  0x3d   : > { %2203 = vmatprep.mubr.f32.mxu0 %v237_v48  ;;  %2296 = vmatprep.mubr.f32.mxu1 %v299_v49  ;;  %v269_v48 = vld [vmem:[%s2504_s14 + $0x160] sm:$0xff]  ;;  %v331_v49 = vld [vmem:[%s2504_s14 + $0x350] sm:$0xff] }
  0x40   : > { %2204 = vmatmul.mubr.f32.gmra.mrb[12].mxu0 %v238_v50  ;;  %2297 = vmatmul.mubr.f32.gmra.mrb[12].mxu1 %v300_v51  ;;  %v270_v50 = vld [vmem:[%s2504_s14 + $0x168] sm:$0xff]  ;;  %v332_v51 = vld [vmem:[%s2504_s14 + $0x358] sm:$0xff] }
  0x41   : > { %2206 = vmatprep.mubr.f32.mxu0 %v239_v52  ;;  %2299 = vmatprep.mubr.f32.mxu1 %v301_v53  ;;  %v271_v52 = vld [vmem:[%s2504_s14 + $0x170] sm:$0xff]  ;;  %v333_v53 = vld [vmem:[%s2504_s14 + $0x360] sm:$0xff] }
  0x44   : > { %2207 = vmatmul.mubr.f32.gmra.mrb[14].mxu0 %v240_v54  ;;  %2300 = vmatmul.mubr.f32.gmra.mrb[14].mxu1 %v302_v55  ;;  %v272_v54 = vld [vmem:[%s2504_s14 + $0x178] sm:$0xff]  ;;  %v334_v55 = vld [vmem:[%s2504_s14 + $0x368] sm:$0xff] }
  0x45   : > { %2209 = vmatprep.mubr.f32.mxu0 %v241_v56  ;;  %2302 = vmatprep.mubr.f32.mxu1 %v303_v57  ;;  %v273_v56 = vld [vmem:[%s2504_s14 + $0x180] sm:$0xff]  ;;  %v335_v57 = vld [vmem:[%s2504_s14 + $0x370] sm:$0xff] }
  0x48   : > { %2210 = vmatmul.mubr.f32.gmra.mrb[16].mxu0 %v242_v58  ;;  %2303 = vmatmul.mubr.f32.gmra.mrb[16].mxu1 %v304_v59  ;;  %v274_v58 = vld [vmem:[%s2504_s14 + $0x188] sm:$0xff]  ;;  %v336_v59 = vld [vmem:[%s2504_s14 + $0x378] sm:$0xff] }
  0x49   : > { %2212 = vmatprep.mubr.f32.mxu0 %v243_v60  ;;  %2305 = vmatprep.mubr.f32.mxu1 %v305_v61  ;;  %v275_v60 = vld [vmem:[%s2504_s14 + $0x190] sm:$0xff]  ;;  %v337_v61 = vld [vmem:[%s2504_s14 + $0x380] sm:$0xff] }
  0x4c   : > { %2213 = vmatmul.mubr.f32.gmra.mrb[18].mxu0 %v244_v62  ;;  %2306 = vmatmul.mubr.f32.gmra.mrb[18].mxu1 %v306_v63  ;;  %v276_v62 = vld [vmem:[%s2504_s14 + $0x198] sm:$0xff]  ;;  %v338_v63 = vld [vmem:[%s2504_s14 + $0x388] sm:$0xff] }
  0x4d   : > { %2215 = vmatprep.mubr.f32.mxu0 %v245_v0  ;;  %2308 = vmatprep.mubr.f32.mxu1 %v307_v1  ;;  %v277_v0 = vld [vmem:[%s2504_s14 + $0x1a0] sm:$0xff]  ;;  %v339_v1 = vld [vmem:[%s2504_s14 + $0x390] sm:$0xff] }
  0x50   : > { %2216 = vmatmul.mubr.f32.gmra.mrb[20].mxu0 %v246_v2  ;;  %2309 = vmatmul.mubr.f32.gmra.mrb[20].mxu1 %v308_v3  ;;  %v278_v2 = vld [vmem:[%s2504_s14 + $0x1a8] sm:$0xff]  ;;  %v340_v3 = vld [vmem:[%s2504_s14 + $0x398] sm:$0xff] }
  0x51   : > { %2218 = vmatprep.mubr.f32.mxu0 %v247_v4  ;;  %2311 = vmatprep.mubr.f32.mxu1 %v309_v5  ;;  %v279_v4 = vld [vmem:[%s2504_s14 + $0x1b0] sm:$0xff]  ;;  %v341_v5 = vld [vmem:[%s2504_s14 + $0x3a0] sm:$0xff] }
  0x54   : > { %2219 = vmatmul.mubr.f32.gmra.mrb[22].mxu0 %v248_v6  ;;  %2312 = vmatmul.mubr.f32.gmra.mrb[22].mxu1 %v310_v7  ;;  %v280_v6 = vld [vmem:[%s2504_s14 + $0x1b8] sm:$0xff]  ;;  %v342_v7 = vld [vmem:[%s2504_s14 + $0x3a8] sm:$0xff] }
  0x55   : > { %2221 = vmatprep.mubr.f32.mxu0 %v249_v8  ;;  %2314 = vmatprep.mubr.f32.mxu1 %v311_v9  ;;  %v281_v8 = vld [vmem:[%s2504_s14 + $0x1c0] sm:$0xff]  ;;  %v343_v9 = vld [vmem:[%s2504_s14 + $0x3b0] sm:$0xff] }
  0x58   : > { %2222 = vmatmul.mubr.f32.gmra.mrb[24].mxu0 %v250_v10  ;;  %2315 = vmatmul.mubr.f32.gmra.mrb[24].mxu1 %v312_v11  ;;  %v282_v10 = vld [vmem:[%s2504_s14 + $0x1c8] sm:$0xff]  ;;  %v344_v11 = vld [vmem:[%s2504_s14 + $0x3b8] sm:$0xff] }
  0x59   : > { %2224 = vmatprep.mubr.f32.mxu0 %v251_v12  ;;  %2317 = vmatprep.mubr.f32.mxu1 %v313_v13  ;;  %v283_v12 = vld [vmem:[%s2504_s14 + $0x1d0] sm:$0xff]  ;;  %v345_v13 = vld [vmem:[%s2504_s14 + $0x3c0] sm:$0xff] }
  0x5c   : > { %2225 = vmatmul.mubr.f32.gmra.mrb[26].mxu0 %v252_v14  ;;  %2318 = vmatmul.mubr.f32.gmra.mrb[26].mxu1 %v314_v15  ;;  %v284_v14 = vld [vmem:[%s2504_s14 + $0x1d8] sm:$0xff]  ;;  %v346_v15 = vld [vmem:[%s2504_s14 + $0x3c8] sm:$0x7f] }
  0x5d   : > { %2227 = vmatprep.mubr.f32.mxu0 %v253_v16  ;;  %2320 = vmatprep.mubr.f32.mxu1 %v315_v17  ;;  %v285_v16 = vld [vmem:[%s2504_s14 + $0x1e0] sm:$0xff]  ;;  %v286_v17 = vld [vmem:[%s2504_s14 + $0x1e8] sm:$0xff] }
  0x60   : > { %2228 = vmatmul.mubr.f32.gmra.mrb[28].mxu0 %v254_v18  ;;  %2321 = vmatmul.mubr.f32.gmra.mrb[28].mxu1 %v316_v19  ;;  %v2655_v18 = vld [vmem:[%s2969_s2] ss:$0 sm:$0xff] }
  0x61   : > { %2230 = vmatprep.mubr.f32.mxu0 %v255_v20  ;;  %2323 = vmatprep.mubr.f32.mxu1 %v317_v21  ;;  %v2660_v20 = vld [vmem:[%s2970_s3] ss:$0 sm:$0xff] }
  0x64   : > { %2231 = vmatmul.mubr.f32.gmra.mrb[30].mxu0 %v256_v22  ;;  %2324 = vmatmul.mubr.f32.gmra.mrb[30].mxu1 %v318_v23 }
  0x65   : > { %2233 = vmatprep.mubr.f32.mxu0 %v257_v24  ;;  %2326 = vmatprep.mubr.f32.mxu1 %v319_v25 }
  0x68   : > { %2234 = vmatmul.mubr.f32.gmra.mrb[32].mxu0 %v258_v26  ;;  %2327 = vmatmul.mubr.f32.gmra.mrb[32].mxu1 %v320_v27 }
  0x69   : > { %2236 = vmatprep.mubr.f32.mxu0 %v259_v28  ;;  %2329 = vmatprep.mubr.f32.mxu1 %v321_v29 }
  0x6c   : > { %2237 = vmatmul.mubr.f32.gmra.mrb[34].mxu0 %v260_v30  ;;  %2330 = vmatmul.mubr.f32.gmra.mrb[34].mxu1 %v322_v31 }
  0x6d   : > { %2239 = vmatprep.mubr.f32.mxu0 %v261_v32  ;;  %2332 = vmatprep.mubr.f32.mxu1 %v323_v33 }
  0x70   : > { %2240 = vmatmul.mubr.f32.gmra.mrb[36].mxu0 %v262_v34  ;;  %2333 = vmatmul.mubr.f32.gmra.mrb[36].mxu1 %v324_v35 }
  0x71   : > { %2242 = vmatprep.mubr.f32.mxu0 %v263_v36  ;;  %2335 = vmatprep.mubr.f32.mxu1 %v325_v37 }
  0x74   : > { %2243 = vmatmul.mubr.f32.gmra.mrb[38].mxu0 %v264_v38  ;;  %2336 = vmatmul.mubr.f32.gmra.mrb[38].mxu1 %v326_v39 }
  0x75   : > { %2245 = vmatprep.mubr.f32.mxu0 %v265_v40  ;;  %2338 = vmatprep.mubr.f32.mxu1 %v327_v41 }
  0x78   : > { %2246 = vmatmul.mubr.f32.gmra.mrb[40].mxu0 %v266_v42  ;;  %2339 = vmatmul.mubr.f32.gmra.mrb[40].mxu1 %v328_v43 }
  0x79   : > { %2248 = vmatprep.mubr.f32.mxu0 %v267_v44  ;;  %2341 = vmatprep.mubr.f32.mxu1 %v329_v45 }
  0x7c   : > { %2249 = vmatmul.mubr.f32.gmra.mrb[42].mxu0 %v268_v46  ;;  %2342 = vmatmul.mubr.f32.gmra.mrb[42].mxu1 %v330_v47 }
  0x7d   : > { %2251 = vmatprep.mubr.f32.mxu0 %v269_v48  ;;  %2344 = vmatprep.mubr.f32.mxu1 %v331_v49 }
  0x80   : > { %2252 = vmatmul.mubr.f32.gmra.mrb[44].mxu0 %v270_v50  ;;  %2345 = vmatmul.mubr.f32.gmra.mrb[44].mxu1 %v332_v51 }
  0x81   : > { %2254 = vmatprep.mubr.f32.mxu0 %v271_v52  ;;  %2347 = vmatprep.mubr.f32.mxu1 %v333_v53 }
  0x84   : > { %2255 = vmatmul.mubr.f32.gmra.mrb[46].mxu0 %v272_v54  ;;  %2348 = vmatmul.mubr.f32.gmra.mrb[46].mxu1 %v334_v55 }
  0x85   : > { %2257 = vmatprep.mubr.f32.mxu0 %v273_v56  ;;  %2350 = vmatprep.mubr.f32.mxu1 %v335_v57 }
  0x88   : > { %2258 = vmatmul.mubr.f32.gmra.mrb[48].mxu0 %v274_v58  ;;  %2351 = vmatmul.mubr.f32.gmra.mrb[48].mxu1 %v336_v59 }
  0x89   : > { %2260 = vmatprep.mubr.f32.mxu0 %v275_v60  ;;  %2353 = vmatprep.mubr.f32.mxu1 %v337_v61 }
  0x8c   : > { %2261 = vmatmul.mubr.f32.gmra.mrb[50].mxu0 %v276_v62  ;;  %2354 = vmatmul.mubr.f32.gmra.mrb[50].mxu1 %v338_v63 }
  0x8d   : > { %2263 = vmatprep.mubr.f32.mxu0 %v277_v0  ;;  %2356 = vmatprep.mubr.f32.mxu1 %v339_v1 }
  0x90   : > { %2264 = vmatmul.mubr.f32.gmra.mrb[52].mxu0 %v278_v2  ;;  %2357 = vmatmul.mubr.f32.gmra.mrb[52].mxu1 %v340_v3 }
  0x91   : > { %2266 = vmatprep.mubr.f32.mxu0 %v279_v4  ;;  %2359 = vmatprep.mubr.f32.mxu1 %v341_v5 }
  0x94   : > { %2267 = vmatmul.mubr.f32.gmra.mrb[54].mxu0 %v280_v6  ;;  %2360 = vmatmul.mubr.f32.gmra.mrb[54].mxu1 %v342_v7 }
  0x95   : > { %2269 = vmatprep.mubr.f32.mxu0 %v281_v8  ;;  %2362 = vmatprep.mubr.f32.mxu1 %v343_v9 }
  0x98   : > { %2270 = vmatmul.mubr.f32.gmra.mrb[56].mxu0 %v282_v10  ;;  %2363 = vmatmul.mubr.f32.gmra.mrb[56].mxu1 %v344_v11 }
  0x99   : > { %2272 = vmatprep.mubr.f32.mxu0 %v283_v12  ;;  %2365 = vmatprep.mubr.f32.mxu1 %v345_v13 }
  0x9c   : > { %2273 = vmatmul.mubr.f32.gmra.mrb[58].mxu0 %v284_v14  ;;  %2366 = vmatmul.mubr.f32.gmra.mrb[58].mxu1 %v346_v15 }
  0x9d   : > { %2275 = vmatprep.mubr.f32.mxu0 %v285_v16 }
  0xa0   : > { %2276 = vmatmul.mubr.f32.gmra.mrb[60].mxu0 %v286_v17 }
  0xfb   : > { %v2187_v19 = vpop.f32.mrb[0].mxu0  ;;  %v2280_v21 = vpop.f32.mrb[0].mxu1 }
  0xfc   : > { %v1046_v22 = vmul.f32 %v2187_v19, %v2655_v18  ;;  %v429_v23 = vpop.f32.mrb[1].mxu0  ;;  %v1108_v24 = vmul.f32 %v2280_v21, %v2655_v18  ;;  %v739_v25 = vpop.f32.mrb[1].mxu1 }
  0xfd   : > { %v1045_v26 = vmul.f32 %v2655_v18, %v429_v23  ;;  %v1107_v27 = vmul.f32 %v2655_v18, %v739_v25 }
  0xfe   : > { %v1175_v28 = vadd.f32 %v2660_v20, %v1046_v22  ;;  %v1237_v29 = vadd.f32 %v2660_v20, %v1108_v24 }
  0xff   : > { %v1174_v30 = vadd.f32 %v2660_v20, %v1045_v26  ;;  %v2190_v31 = vpop.f32.mrb[2].mxu0  ;;  %v1236_v32 = vadd.f32 %v2660_v20, %v1107_v27  ;;  %v2283_v33 = vpop.f32.mrb[2].mxu1 }
 0x100   : > { %v1297_v34 = vmax.f32 %v1175_v28, 0.0  ;;  %v1359_v35 = vmax.f32 %v1237_v29, 0.0  ;;  %v1048_v36 = vmul.f32 %v2190_v31, %v2655_v18  ;;  %v439_v37 = vpop.f32.mrb[3].mxu0  ;;  %v1110_v38 = vmul.f32 %v2283_v33, %v2655_v18  ;;  %v749_v39 = vpop.f32.mrb[3].mxu1 }
 0x101   : > { %v1296_v40 = vmax.f32 %v1174_v30, 0.0  ;;  %v1358_v41 = vmax.f32 %v1236_v32, 0.0  ;;  %v1047_v42 = vmul.f32 %v2655_v18, %v439_v37  ;;  %v1109_v43 = vmul.f32 %v2655_v18, %v749_v39 }
 0x102   : > { %1419 = vst [vmem:[#allocation2 + $0x8] sm:$0xff] %v1297_v34  ;;  %1481 = vst [vmem:[#allocation2 + $0x1f8] sm:$0xff] %v1359_v35  ;;  %v1177_v44 = vadd.f32 %v2660_v20, %v1048_v36  ;;  %v1239_v45 = vadd.f32 %v2660_v20, %v1110_v38 }
 0x103   : > { %1418 = vst [vmem:[#allocation2] sm:$0xff] %v1296_v40  ;;  %1480 = vst [vmem:[#allocation2 + $0x1f0] sm:$0xff] %v1358_v41  ;;  %v1176_v46 = vadd.f32 %v2660_v20, %v1047_v42  ;;  %v2193_v47 = vpop.f32.mrb[4].mxu0  ;;  %v1238_v48 = vadd.f32 %v2660_v20, %v1109_v43  ;;  %v2286_v49 = vpop.f32.mrb[4].mxu1 }
 0x104   : > { %v1299_v50 = vmax.f32 %v1177_v44, 0.0  ;;  %v1361_v51 = vmax.f32 %v1239_v45, 0.0  ;;  %v1050_v52 = vmul.f32 %v2193_v47, %v2655_v18  ;;  %v449_v53 = vpop.f32.mrb[5].mxu0  ;;  %v1112_v54 = vmul.f32 %v2286_v49, %v2655_v18  ;;  %v759_v55 = vpop.f32.mrb[5].mxu1 }
 0x105   : > { %v1298_v56 = vmax.f32 %v1176_v46, 0.0  ;;  %v1360_v57 = vmax.f32 %v1238_v48, 0.0  ;;  %v1049_v58 = vmul.f32 %v2655_v18, %v449_v53  ;;  %v1111_v59 = vmul.f32 %v2655_v18, %v759_v55 }
 0x106   : > { %1421 = vst [vmem:[#allocation2 + $0x18] sm:$0xff] %v1299_v50  ;;  %1483 = vst [vmem:[#allocation2 + $0x208] sm:$0xff] %v1361_v51  ;;  %v1179_v60 = vadd.f32 %v2660_v20, %v1050_v52  ;;  %v1241_v61 = vadd.f32 %v2660_v20, %v1112_v54 }
 0x107   : > { %1420 = vst [vmem:[#allocation2 + $0x10] sm:$0xff] %v1298_v56  ;;  %1482 = vst [vmem:[#allocation2 + $0x200] sm:$0xff] %v1360_v57  ;;  %v1178_v62 = vadd.f32 %v2660_v20, %v1049_v58  ;;  %v2196_v63 = vpop.f32.mrb[6].mxu0  ;;  %v1240_v0 = vadd.f32 %v2660_v20, %v1111_v59  ;;  %v2289_v1 = vpop.f32.mrb[6].mxu1 }
 0x108   : > { %v1301_v2 = vmax.f32 %v1179_v60, 0.0  ;;  %v1363_v3 = vmax.f32 %v1241_v61, 0.0  ;;  %v1052_v4 = vmul.f32 %v2196_v63, %v2655_v18  ;;  %v459_v5 = vpop.f32.mrb[7].mxu0  ;;  %v1114_v6 = vmul.f32 %v2289_v1, %v2655_v18  ;;  %v769_v7 = vpop.f32.mrb[7].mxu1 }
 0x109   : > { %v1300_v8 = vmax.f32 %v1178_v62, 0.0  ;;  %v1362_v9 = vmax.f32 %v1240_v0, 0.0  ;;  %v1051_v10 = vmul.f32 %v2655_v18, %v459_v5  ;;  %v1113_v11 = vmul.f32 %v2655_v18, %v769_v7 }
 0x10a   : > { %1423 = vst [vmem:[#allocation2 + $0x28] sm:$0xff] %v1301_v2  ;;  %1485 = vst [vmem:[#allocation2 + $0x218] sm:$0xff] %v1363_v3  ;;  %v1181_v12 = vadd.f32 %v2660_v20, %v1052_v4  ;;  %v1243_v13 = vadd.f32 %v2660_v20, %v1114_v6 }
 0x10b   : > { %1422 = vst [vmem:[#allocation2 + $0x20] sm:$0xff] %v1300_v8  ;;  %1484 = vst [vmem:[#allocation2 + $0x210] sm:$0xff] %v1362_v9  ;;  %v1180_v14 = vadd.f32 %v2660_v20, %v1051_v10  ;;  %v2199_v15 = vpop.f32.mrb[8].mxu0  ;;  %v1242_v16 = vadd.f32 %v2660_v20, %v1113_v11  ;;  %v2292_v17 = vpop.f32.mrb[8].mxu1 }
 0x10c   : > { %v1303_v19 = vmax.f32 %v1181_v12, 0.0  ;;  %v1365_v21 = vmax.f32 %v1243_v13, 0.0  ;;  %v1054_v22 = vmul.f32 %v2199_v15, %v2655_v18  ;;  %v469_v23 = vpop.f32.mrb[9].mxu0  ;;  %v1116_v24 = vmul.f32 %v2292_v17, %v2655_v18  ;;  %v779_v25 = vpop.f32.mrb[9].mxu1 }
 0x10d   : > { %v1302_v26 = vmax.f32 %v1180_v14, 0.0  ;;  %v1364_v27 = vmax.f32 %v1242_v16, 0.0  ;;  %v1053_v28 = vmul.f32 %v2655_v18, %v469_v23  ;;  %v1115_v29 = vmul.f32 %v2655_v18, %v779_v25 }
 0x10e   : > { %1425 = vst [vmem:[#allocation2 + $0x38] sm:$0xff] %v1303_v19  ;;  %1487 = vst [vmem:[#allocation2 + $0x228] sm:$0xff] %v1365_v21  ;;  %v1183_v30 = vadd.f32 %v2660_v20, %v1054_v22  ;;  %v1245_v31 = vadd.f32 %v2660_v20, %v1116_v24 }
 0x10f   : > { %1424 = vst [vmem:[#allocation2 + $0x30] sm:$0xff] %v1302_v26  ;;  %1486 = vst [vmem:[#allocation2 + $0x220] sm:$0xff] %v1364_v27  ;;  %v1182_v32 = vadd.f32 %v2660_v20, %v1053_v28  ;;  %v2202_v33 = vpop.f32.mrb[10].mxu0  ;;  %v1244_v34 = vadd.f32 %v2660_v20, %v1115_v29  ;;  %v2295_v35 = vpop.f32.mrb[10].mxu1 }
 0x110   : > { %v1305_v36 = vmax.f32 %v1183_v30, 0.0  ;;  %v1367_v37 = vmax.f32 %v1245_v31, 0.0  ;;  %v1056_v38 = vmul.f32 %v2202_v33, %v2655_v18  ;;  %v479_v39 = vpop.f32.mrb[11].mxu0  ;;  %v1118_v40 = vmul.f32 %v2295_v35, %v2655_v18  ;;  %v789_v41 = vpop.f32.mrb[11].mxu1 }
 0x111   : > { %v1304_v42 = vmax.f32 %v1182_v32, 0.0  ;;  %v1366_v43 = vmax.f32 %v1244_v34, 0.0  ;;  %v1055_v44 = vmul.f32 %v2655_v18, %v479_v39  ;;  %v1117_v45 = vmul.f32 %v2655_v18, %v789_v41 }
 0x112   : > { %1427 = vst [vmem:[#allocation2 + $0x48] sm:$0xff] %v1305_v36  ;;  %1489 = vst [vmem:[#allocation2 + $0x238] sm:$0xff] %v1367_v37  ;;  %v1185_v46 = vadd.f32 %v2660_v20, %v1056_v38  ;;  %v1247_v47 = vadd.f32 %v2660_v20, %v1118_v40 }
 0x113   : > { %1426 = vst [vmem:[#allocation2 + $0x40] sm:$0xff] %v1304_v42  ;;  %1488 = vst [vmem:[#allocation2 + $0x230] sm:$0xff] %v1366_v43  ;;  %v1184_v48 = vadd.f32 %v2660_v20, %v1055_v44  ;;  %v2205_v49 = vpop.f32.mrb[12].mxu0  ;;  %v1246_v50 = vadd.f32 %v2660_v20, %v1117_v45  ;;  %v2298_v51 = vpop.f32.mrb[12].mxu1 }
 0x114   : > { %v1307_v52 = vmax.f32 %v1185_v46, 0.0  ;;  %v1369_v53 = vmax.f32 %v1247_v47, 0.0  ;;  %v1058_v54 = vmul.f32 %v2205_v49, %v2655_v18  ;;  %v489_v55 = vpop.f32.mrb[13].mxu0  ;;  %v1120_v56 = vmul.f32 %v2298_v51, %v2655_v18  ;;  %v799_v57 = vpop.f32.mrb[13].mxu1 }
 0x115   : > { %v1306_v58 = vmax.f32 %v1184_v48, 0.0  ;;  %v1368_v59 = vmax.f32 %v1246_v50, 0.0  ;;  %v1057_v60 = vmul.f32 %v2655_v18, %v489_v55  ;;  %v1119_v61 = vmul.f32 %v2655_v18, %v799_v57 }
 0x116   : > { %1429 = vst [vmem:[#allocation2 + $0x58] sm:$0xff] %v1307_v52  ;;  %1491 = vst [vmem:[#allocation2 + $0x248] sm:$0xff] %v1369_v53  ;;  %v1187_v62 = vadd.f32 %v2660_v20, %v1058_v54  ;;  %v1249_v63 = vadd.f32 %v2660_v20, %v1120_v56 }
 0x117   : > { %1428 = vst [vmem:[#allocation2 + $0x50] sm:$0xff] %v1306_v58  ;;  %1490 = vst [vmem:[#allocation2 + $0x240] sm:$0xff] %v1368_v59  ;;  %v1186_v0 = vadd.f32 %v2660_v20, %v1057_v60  ;;  %v1248_v1 = vadd.f32 %v2660_v20, %v1119_v61  ;;  %v2208_v2 = vpop.f32.mrb[14].mxu0  ;;  %v2301_v3 = vpop.f32.mrb[14].mxu1 }
 0x118   : > { %v1309_v4 = vmax.f32 %v1187_v62, 0.0  ;;  %v1371_v5 = vmax.f32 %v1249_v63, 0.0  ;;  %v1060_v6 = vmul.f32 %v2208_v2, %v2655_v18  ;;  %v1122_v7 = vmul.f32 %v2301_v3, %v2655_v18  ;;  %v499_v8 = vpop.f32.mrb[15].mxu0  ;;  %v809_v9 = vpop.f32.mrb[15].mxu1 }
 0x119   : > { %v1308_v10 = vmax.f32 %v1186_v0, 0.0  ;;  %v1370_v11 = vmax.f32 %v1248_v1, 0.0  ;;  %v1059_v12 = vmul.f32 %v2655_v18, %v499_v8  ;;  %v1121_v13 = vmul.f32 %v2655_v18, %v809_v9 }
 0x11a   : > { %1431 = vst [vmem:[#allocation2 + $0x68] sm:$0xff] %v1309_v4  ;;  %1493 = vst [vmem:[#allocation2 + $0x258] sm:$0xff] %v1371_v5  ;;  %v1189_v14 = vadd.f32 %v2660_v20, %v1060_v6  ;;  %v1251_v15 = vadd.f32 %v2660_v20, %v1122_v7 }
 0x11b   : > { %1430 = vst [vmem:[#allocation2 + $0x60] sm:$0xff] %v1308_v10  ;;  %1492 = vst [vmem:[#allocation2 + $0x250] sm:$0xff] %v1370_v11  ;;  %v1188_v16 = vadd.f32 %v2660_v20, %v1059_v12  ;;  %v1250_v17 = vadd.f32 %v2660_v20, %v1121_v13  ;;  %v2211_v19 = vpop.f32.mrb[16].mxu0  ;;  %v2304_v21 = vpop.f32.mrb[16].mxu1 }
 0x11c   : > { %v1311_v22 = vmax.f32 %v1189_v14, 0.0  ;;  %v1373_v23 = vmax.f32 %v1251_v15, 0.0  ;;  %v1062_v24 = vmul.f32 %v2211_v19, %v2655_v18  ;;  %v509_v25 = vpop.f32.mrb[17].mxu0  ;;  %v1124_v26 = vmul.f32 %v2304_v21, %v2655_v18  ;;  %v819_v27 = vpop.f32.mrb[17].mxu1 }
 0x11d   : > { %v1540_v28 = vld [vmem:[#allocation2] ss:$13 sm:$0xff]  ;;  %v1310_v30 = vmax.f32 %v1188_v16, 0.0  ;;  %v1372_v31 = vmax.f32 %v1250_v17, 0.0  ;;  %v1061_v32 = vmul.f32 %v2655_v18, %v509_v25  ;;  %v1123_v33 = vmul.f32 %v2655_v18, %v819_v27 }
 0x11e   : > { %v1560_v29 = vld [vmem:[#allocation2 + $0x1] ss:$13 sm:$0xff]  ;;  %1433 = vst [vmem:[#allocation2 + $0x78] sm:$0xff] %v1311_v22  ;;  %1495 = vst [vmem:[#allocation2 + $0x268] sm:$0xff] %v1373_v23  ;;  %v1191_v36 = vadd.f32 %v2660_v20, %v1062_v24  ;;  %v1253_v37 = vadd.f32 %v2660_v20, %v1124_v26  ;;  %v1620_v48 = vld [vmem:[#allocation2 + $0x3] ss:$13 sm:$0xff] }
 0x11f   : > { %v1579_v34 = vmax.f32 %v1540_v28, %v1560_v29  ;;  %v1590_v35 = vld [vmem:[#allocation2 + $0x2] ss:$13 sm:$0xff]  ;;  %1432 = vst [vmem:[#allocation2 + $0x70] sm:$0xff] %v1310_v30  ;;  %1494 = vst [vmem:[#allocation2 + $0x260] sm:$0xff] %v1372_v31  ;;  %v1190_v38 = vadd.f32 %v2660_v20, %v1061_v32  ;;  %v2214_v39 = vpop.f32.mrb[18].mxu0  ;;  %v1252_v40 = vadd.f32 %v2660_v20, %v1123_v33  ;;  %v2307_v41 = vpop.f32.mrb[18].mxu1 }
 0x120   : > { %v1313_v43 = vmax.f32 %v1191_v36, 0.0  ;;  %v1375_v44 = vmax.f32 %v1253_v37, 0.0  ;;  %v1064_v45 = vmul.f32 %v2214_v39, %v2655_v18  ;;  %v519_v46 = vpop.f32.mrb[19].mxu0  ;;  %v829_v47 = vpop.f32.mrb[19].mxu1  ;;  %v1126_v52 = vmul.f32 %v2307_v41, %v2655_v18  ;;  %v1650_v56 = vld [vmem:[#allocation2 + $0x4] ss:$13 sm:$0xff] }
 0x121   : > { %v1609_v42 = vmax.f32 %v1579_v34, %v1590_v35  ;;  %v1312_v49 = vmax.f32 %v1190_v38, 0.0  ;;  %v1374_v50 = vmax.f32 %v1252_v40, 0.0  ;;  %v1063_v51 = vmul.f32 %v2655_v18, %v519_v46 }
 0x122   : > { %1435 = vst [vmem:[#allocation2 + $0x88] sm:$0xff] %v1313_v43  ;;  %1497 = vst [vmem:[#allocation2 + $0x278] sm:$0xff] %v1375_v44  ;;  %v1193_v54 = vadd.f32 %v2660_v20, %v1064_v45  ;;  %v1125_v55 = vmul.f32 %v2655_v18, %v829_v47  ;;  %v1680_v60 = vld [vmem:[#allocation2 + $0x5] ss:$13 sm:$0xff]  ;;  %v1255_v62 = vadd.f32 %v2660_v20, %v1126_v52  ;;  %v1740_v7 = vld [vmem:[#allocation2 + $0x7] ss:$13 sm:$0xff] }
 0x123   : > { %v1639_v53 = vmax.f32 %v1609_v42, %v1620_v48  ;;  %1434 = vst [vmem:[#allocation2 + $0x80] sm:$0xff] %v1312_v49  ;;  %1496 = vst [vmem:[#allocation2 + $0x270] sm:$0xff] %v1374_v50  ;;  %v2217_v59 = vpop.f32.mrb[20].mxu0  ;;  %v1192_v61 = vadd.f32 %v2660_v20, %v1063_v51  ;;  %v1710_v3 = vld [vmem:[#allocation2 + $0x6] ss:$13 sm:$0xff]  ;;  %v2310_v17 = vpop.f32.mrb[20].mxu1 }
 0x124   : > { %v1315_v58 = vmax.f32 %v1193_v54, 0.0  ;;  %v1066_v63 = vmul.f32 %v2217_v59, %v2655_v18  ;;  %v1254_v0 = vadd.f32 %v2660_v20, %v1125_v55  ;;  %v1377_v11 = vmax.f32 %v1255_v62, 0.0  ;;  %v529_v16 = vpop.f32.mrb[21].mxu0  ;;  %v1770_v19 = vld [vmem:[#allocation2 + $0x8] ss:$13 sm:$0xff]  ;;  %v839_v25 = vpop.f32.mrb[21].mxu1 }
 0x125   : > { %v1669_v57 = vmax.f32 %v1639_v53, %v1650_v56  ;;  %v1314_v10 = vmax.f32 %v1192_v61, 0.0  ;;  %v1065_v22 = vmul.f32 %v2655_v18, %v529_v16  ;;  %v1128_v23 = vmul.f32 %v2310_v17, %v2655_v18  ;;  %v1800_v32 = vld [vmem:[#allocation2 + $0x9] ss:$13 sm:$0xff]  ;;  %v1690_v47 = vld [vmem:[#allocation2 + $0x20d] ss:$13 sm:$0xff] }
 0x126   : > { %v1550_v2 = vld [vmem:[#allocation2 + $0x208] ss:$13 sm:$0xff]  ;;  %1437 = vst [vmem:[#allocation2 + $0x98] sm:$0xff] %v1315_v58  ;;  %v1195_v5 = vadd.f32 %v2660_v20, %v1066_v63  ;;  %v1600_v9 = vld [vmem:[#allocation2 + $0x20a] ss:$13 sm:$0xff]  ;;  %v1376_v13 = vmax.f32 %v1254_v0, 0.0  ;;  %v1127_v29 = vmul.f32 %v2655_v18, %v839_v25 }
 0x127   : > { %v1699_v1 = vmax.f32 %v1669_v57, %v1680_v60  ;;  %v1570_v4 = vld [vmem:[#allocation2 + $0x209] ss:$13 sm:$0xff]  ;;  %v1630_v21 = vld [vmem:[#allocation2 + $0x20b] ss:$13 sm:$0xff]  ;;  %1436 = vst [vmem:[#allocation2 + $0x90] sm:$0xff] %v1314_v10  ;;  %1499 = vst [vmem:[#allocation2 + $0x288] sm:$0xff] %v1377_v11  ;;  %v1194_v34 = vadd.f32 %v2660_v20, %v1065_v22  ;;  %v1257_v35 = vadd.f32 %v2660_v20, %v1128_v23 }
 0x128   : > { %v1584_v8 = vmax.f32 %v1550_v2, %v1570_v4  ;;  %v1317_v12 = vmax.f32 %v1195_v5, 0.0  ;;  %1498 = vst [vmem:[#allocation2 + $0x280] sm:$0xff] %v1376_v13  ;;  %v2220_v24 = vpop.f32.mrb[22].mxu0  ;;  %v2313_v31 = vpop.f32.mrb[22].mxu1  ;;  %v1660_v33 = vld [vmem:[#allocation2 + $0x20c] ss:$13 sm:$0xff]  ;;  %v1256_v44 = vadd.f32 %v2660_v20, %v1127_v29 }
 0x129   : > { %v1729_v6 = vmax.f32 %v1699_v1, %v1710_v3  ;;  %v1068_v28 = vmul.f32 %v2220_v24, %v2655_v18  ;;  %v539_v30 = vpop.f32.mrb[23].mxu0  ;;  %v1130_v37 = vmul.f32 %v2313_v31, %v2655_v18  ;;  %v849_v39 = vpop.f32.mrb[23].mxu1  ;;  %v1830_v41 = vld [vmem:[#allocation2 + $0xa] ss:$13 sm:$0xff]  ;;  %v1316_v48 = vmax.f32 %v1194_v34, 0.0 }
 0x12a   : > { %v1614_v15 = vmax.f32 %v1584_v8, %v1600_v9  ;;  %1439 = vst [vmem:[#allocation2 + $0xa8] sm:$0xff] %v1317_v12  ;;  %v1067_v36 = vmul.f32 %v2655_v18, %v539_v30  ;;  %v1379_v49 = vmax.f32 %v1257_v35, 0.0  ;;  %v1860_v55 = vld [vmem:[#allocation2 + $0xb] ss:$13 sm:$0xff]  ;;  %v1378_v58 = vmax.f32 %v1256_v44, 0.0 }
 0x12b   : > { %v1759_v14 = vmax.f32 %v1729_v6, %v1740_v7  ;;  %v2223_v38 = vpop.f32.mrb[24].mxu0  ;;  %v1197_v43 = vadd.f32 %v2660_v20, %v1068_v28  ;;  %v2316_v46 = vpop.f32.mrb[24].mxu1  ;;  %v1259_v51 = vadd.f32 %v2660_v20, %v1130_v37  ;;  %v1720_v61 = vld [vmem:[#allocation2 + $0x20e] ss:$13 sm:$0xff]  ;;  %1438 = vst [vmem:[#allocation2 + $0xa0] sm:$0xff] %v1316_v48  ;;  %v1129_v1 = vmul.f32 %v2655_v18, %v849_v39 }
 0x12c   : > { %v1644_v27 = vmax.f32 %v1614_v15, %v1630_v21  ;;  %v549_v45 = vpop.f32.mrb[25].mxu0  ;;  %v1196_v50 = vadd.f32 %v2660_v20, %v1067_v36  ;;  %v859_v52 = vpop.f32.mrb[25].mxu1  ;;  %1501 = vst [vmem:[#allocation2 + $0x298] sm:$0xff] %v1379_v49  ;;  %v1070_v0 = vmul.f32 %v2223_v38, %v2655_v18  ;;  %v1919_v4 = vld [vmem:[%s2971_s4] sm:$0xff]  ;;  %1500 = vst [vmem:[#allocation2 + $0x290] sm:$0xff] %v1378_v58 }
 0x12d   : > { %v1789_v26 = vmax.f32 %v1759_v14, %v1770_v19  ;;  %v1319_v57 = vmax.f32 %v1197_v43, 0.0  ;;  %v1381_v63 = vmax.f32 %v1259_v51, 0.0  ;;  %v1069_v6 = vmul.f32 %v2655_v18, %v549_v45  ;;  %v1890_v8 = vld [vmem:[#allocation2 + $0xc] ss:$13 sm:$0xff]  ;;  %v1750_v9 = vld [vmem:[#allocation2 + $0x20f] ss:$13 sm:$0xff] }
 0x12e   : > { %v1674_v42 = vmax.f32 %v1644_v27, %v1660_v33  ;;  %v1318_v62 = vmax.f32 %v1196_v50, 0.0  ;;  %v1132_v7 = vmul.f32 %v2316_v46, %v2655_v18  ;;  %v1199_v10 = vadd.f32 %v2660_v20, %v1070_v0  ;;  %v1780_v24 = vld [vmem:[#allocation2 + $0x210] ss:$13 sm:$0xff]  ;;  %v1840_v46 = vld [vmem:[#allocation2 + $0x212] ss:$13 sm:$0xff] }
 0x12f   : > { %v1819_v40 = vmax.f32 %v1789_v26, %v1800_v32  ;;  %v2226_v53 = vpop.f32.mrb[26].mxu0  ;;  %v2319_v59 = vpop.f32.mrb[26].mxu1  ;;  %1441 = vst [vmem:[#allocation2 + $0xb8] sm:$0xff] %v1319_v57  ;;  %1503 = vst [vmem:[#allocation2 + $0x2a8] sm:$0xff] %v1381_v63  ;;  %v1258_v11 = vadd.f32 %v2660_v20, %v1129_v1  ;;  %v1131_v12 = vmul.f32 %v2655_v18, %v859_v52  ;;  %v1810_v33 = vld [vmem:[#allocation2 + $0x211] ss:$13 sm:$0xff] }
 0x130   : > { %v1704_v56 = vmax.f32 %v1674_v42, %v1690_v47  ;;  %v559_v60 = vpop.f32.mrb[27].mxu0  ;;  %v869_v2 = vpop.f32.mrb[27].mxu1  ;;  %1440 = vst [vmem:[#allocation2 + $0xb0] sm:$0xff] %v1318_v62  ;;  %v1072_v13 = vmul.f32 %v2226_v53, %v2655_v18  ;;  %v1198_v19 = vadd.f32 %v2660_v20, %v1069_v6  ;;  %v1261_v21 = vadd.f32 %v2660_v20, %v1132_v7 }
 0x131   : > { %v1849_v54 = vmax.f32 %v1819_v40, %v1830_v41  ;;  %v1321_v25 = vmax.f32 %v1199_v10, 0.0  ;;  %v1380_v26 = vmax.f32 %v1258_v11, 0.0  ;;  %v1260_v27 = vadd.f32 %v2660_v20, %v1131_v12 }
 0x132   : > { %v1734_v5 = vmax.f32 %v1704_v56, %v1720_v61  ;;  %v1201_v28 = vadd.f32 %v2660_v20, %v1072_v13  ;;  %v1320_v31 = vmax.f32 %v1198_v19, 0.0  ;;  %v1383_v32 = vmax.f32 %v1261_v21, 0.0 }
 0x133   : > { %v1879_v3 = vmax.f32 %v1849_v54, %v1860_v55  ;;  %v2229_v14 = vpop.f32.mrb[28].mxu0  ;;  %v2322_v15 = vpop.f32.mrb[28].mxu1  ;;  %1443 = vst [vmem:[#allocation2 + $0xc8] sm:$0xff] %v1321_v25  ;;  %1502 = vst [vmem:[#allocation2 + $0x2a0] sm:$0xff] %v1380_v26  ;;  %v1382_v34 = vmax.f32 %v1260_v27, 0.0  ;;  %v1134_v36 = vmul.f32 %v2319_v59, %v2655_v18  ;;  %v1071_v37 = vmul.f32 %v2655_v18, %v559_v60 }
 0x134   : > { %v1764_v17 = vmax.f32 %v1734_v5, %v1750_v9  ;;  %v569_v22 = vpop.f32.mrb[29].mxu0  ;;  %v879_v23 = vpop.f32.mrb[29].mxu1  ;;  %v1323_v35 = vmax.f32 %v1201_v28, 0.0  ;;  %1442 = vst [vmem:[#allocation2 + $0xc0] sm:$0xff] %v1320_v31  ;;  %1505 = vst [vmem:[#allocation2 + $0x2b8] sm:$0xff] %v1383_v32  ;;  %v1133_v41 = vmul.f32 %v2655_v18, %v869_v2  ;;  %v1074_v42 = vmul.f32 %v2229_v14, %v2655_v18  ;;  %v1924_v5 = vld [vmem:[%s2971_s4 + $0x28] sm:$0xff] }
 0x135   : > { %v1909_v16 = vmax.f32 %v1879_v3, %v1890_v8  ;;  %v1136_v43 = vmul.f32 %v2322_v15, %v2655_v18  ;;  %1504 = vst [vmem:[#allocation2 + $0x2b0] sm:$0xff] %v1382_v34  ;;  %v1263_v47 = vadd.f32 %v2660_v20, %v1134_v36  ;;  %v1200_v48 = vadd.f32 %v2660_v20, %v1071_v37  ;;  %v1870_v55 = vld [vmem:[#allocation2 + $0x213] ss:$13 sm:$0xff] }
 0x136   : > { %v1794_v30 = vmax.f32 %v1764_v17, %v1780_v24  ;;  %1445 = vst [vmem:[#allocation2 + $0xd8] sm:$0xff] %v1323_v35  ;;  %v1073_v49 = vmul.f32 %v2655_v18, %v569_v22  ;;  %v1135_v50 = vmul.f32 %v2655_v18, %v879_v23  ;;  %v1262_v52 = vadd.f32 %v2660_v20, %v1133_v41 }
 0x137   : > { %v1929_v29 = vadd.f32 %v1919_v4, %v1909_v16  ;;  %v2232_v38 = vpop.f32.mrb[30].mxu0  ;;  %v2325_v39 = vpop.f32.mrb[30].mxu1  ;;  %v1203_v53 = vadd.f32 %v2660_v20, %v1074_v42  ;;  %v1265_v54 = vadd.f32 %v2660_v20, %v1136_v43  ;;  %v1385_v56 = vmax.f32 %v1263_v47, 0.0  ;;  %v1900_v4 = vld [vmem:[#allocation2 + $0x214] ss:$13 sm:$0xff] }
 0x138   : > { %v1824_v40 = vmax.f32 %v1794_v30, %v1810_v33  ;;  %v579_v44 = vpop.f32.mrb[31].mxu0  ;;  %v889_v45 = vpop.f32.mrb[31].mxu1  ;;  %v1322_v57 = vmax.f32 %v1200_v48, 0.0  ;;  %v1202_v58 = vadd.f32 %v2660_v20, %v1073_v49  ;;  %v1264_v59 = vadd.f32 %v2660_v20, %v1135_v50 }
 0x139   : > { %1939 = vst [vmem:[%s2775_s17] sm:$0xff] %v1929_v29  ;;  %v1384_v63 = vmax.f32 %v1262_v52, 0.0  ;;  %v1325_v0 = vmax.f32 %v1203_v53, 0.0  ;;  %v1387_v1 = vmax.f32 %v1265_v54, 0.0  ;;  %1507 = vst [vmem:[#allocation2 + $0x2c8] sm:$0xff] %v1385_v56  ;;  %v1076_v8 = vmul.f32 %v2232_v38, %v2655_v18 }
 0x13a   : > { %v1854_v51 = vmax.f32 %v1824_v40, %v1840_v46  ;;  %1444 = vst [vmem:[#allocation2 + $0xd0] sm:$0xff] %v1322_v57  ;;  %v1324_v6 = vmax.f32 %v1202_v58, 0.0  ;;  %v1386_v7 = vmax.f32 %v1264_v59, 0.0  ;;  %v1075_v9 = vmul.f32 %v2655_v18, %v579_v44 }
 0x13b   : > { %v2235_v60 = vpop.f32.mrb[32].mxu0  ;;  %v2328_v61 = vpop.f32.mrb[32].mxu1  ;;  %1506 = vst [vmem:[#allocation2 + $0x2c0] sm:$0xff] %v1384_v63  ;;  %1447 = vst [vmem:[#allocation2 + $0xe8] sm:$0xff] %v1325_v0  ;;  %v1138_v11 = vmul.f32 %v2325_v39, %v2655_v18  ;;  %v1137_v13 = vmul.f32 %v2655_v18, %v889_v45  ;;  %v1542_v14 = vld [vmem:[#allocation2 + $0x68] ss:$13 sm:$0xff]  ;;  %v1205_v15 = vadd.f32 %v2660_v20, %v1076_v8 }
 0x13c   : > { %v1884_v62 = vmax.f32 %v1854_v51, %v1870_v55  ;;  %v589_v2 = vpop.f32.mrb[33].mxu0  ;;  %v899_v3 = vpop.f32.mrb[33].mxu1  ;;  %1509 = vst [vmem:[#allocation2 + $0x2d8] sm:$0xff] %v1387_v1  ;;  %v1078_v12 = vmul.f32 %v2235_v60, %v2655_v18  ;;  %1446 = vst [vmem:[#allocation2 + $0xe0] sm:$0xff] %v1324_v6  ;;  %v1204_v16 = vadd.f32 %v2660_v20, %v1075_v9  ;;  %v1562_v22 = vld [vmem:[#allocation2 + $0x69] ss:$13 sm:$0xff] }
 0x13d   : > { %1508 = vst [vmem:[#allocation2 + $0x2d0] sm:$0xff] %v1386_v7  ;;  %v1077_v17 = vmul.f32 %v2655_v18, %v589_v2  ;;  %v1140_v19 = vmul.f32 %v2328_v61, %v2655_v18  ;;  %v1267_v23 = vadd.f32 %v2660_v20, %v1138_v11  ;;  %v1266_v25 = vadd.f32 %v2660_v20, %v1137_v13  ;;  %v1592_v27 = vld [vmem:[#allocation2 + $0x6a] ss:$13 sm:$0xff]  ;;  %v1652_v54 = vld [vmem:[#allocation2 + $0x6c] ss:$13 sm:$0xff] }
 0x13e   : > { %v1914_v10 = vmax.f32 %v1884_v62, %v1900_v4  ;;  %v1207_v24 = vadd.f32 %v2660_v20, %v1078_v12  ;;  %v1580_v26 = vmax.f32 %v1542_v14, %v1562_v22  ;;  %v1139_v30 = vmul.f32 %v2655_v18, %v899_v3  ;;  %v1622_v31 = vld [vmem:[#allocation2 + $0x6b] ss:$13 sm:$0xff]  ;;  %v1682_v61 = vld [vmem:[#allocation2 + $0x6d] ss:$13 sm:$0xff]  ;;  %v1742_v22 = vld [vmem:[#allocation2 + $0x6f] ss:$13 sm:$0xff] }
 0x13f   : > { %v1206_v28 = vadd.f32 %v2660_v20, %v1077_v17  ;;  %v1269_v29 = vadd.f32 %v2660_v20, %v1140_v19  ;;  %v1327_v32 = vmax.f32 %v1205_v15, 0.0  ;;  %v1326_v33 = vmax.f32 %v1204_v16, 0.0  ;;  %v2238_v40 = vpop.f32.mrb[34].mxu0  ;;  %v2331_v41 = vpop.f32.mrb[34].mxu1  ;;  %v1712_v1 = vld [vmem:[#allocation2 + $0x6e] ss:$13 sm:$0xff] }
 0x140   : > { %v1934_v21 = vadd.f32 %v1924_v5, %v1914_v10  ;;  %v1389_v34 = vmax.f32 %v1267_v23, 0.0  ;;  %v1329_v35 = vmax.f32 %v1207_v24, 0.0  ;;  %v1610_v36 = vmax.f32 %v1580_v26, %v1592_v27  ;;  %v1552_v42 = vld [vmem:[#allocation2 + $0x270] ss:$13 sm:$0xff]  ;;  %v599_v46 = vpop.f32.mrb[35].mxu0  ;;  %v909_v48 = vpop.f32.mrb[35].mxu1 }
 0x141   : > { %v1388_v37 = vmax.f32 %v1266_v25, 0.0  ;;  %v1328_v38 = vmax.f32 %v1206_v28, 0.0  ;;  %v1391_v39 = vmax.f32 %v1269_v29, 0.0  ;;  %v1572_v43 = vld [vmem:[#allocation2 + $0x271] ss:$13 sm:$0xff]  ;;  %1449 = vst [vmem:[#allocation2 + $0xf8] sm:$0xff] %v1327_v32  ;;  %v1080_v44 = vmul.f32 %v2238_v40, %v2655_v18 }
 0x142   : > { %1944 = vst [vmem:[%s2775_s17 + $0x28] sm:$0xff] %v1934_v21  ;;  %1448 = vst [vmem:[#allocation2 + $0xf0] sm:$0xff] %v1326_v33  ;;  %v1268_v45 = vadd.f32 %v2660_v20, %v1139_v30  ;;  %v1142_v47 = vmul.f32 %v2331_v41, %v2655_v18  ;;  %v1640_v49 = vmax.f32 %v1610_v36, %v1622_v31  ;;  %v1602_v51 = vld [vmem:[#allocation2 + $0x272] ss:$13 sm:$0xff]  ;;  %v1662_v8 = vld [vmem:[#allocation2 + $0x274] ss:$13 sm:$0xff] }
 0x143   : > { %1511 = vst [vmem:[#allocation2 + $0x2e8] sm:$0xff] %v1389_v34  ;;  %1451 = vst [vmem:[#allocation2 + $0x108] sm:$0xff] %v1329_v35  ;;  %v1585_v50 = vmax.f32 %v1552_v42, %v1572_v43  ;;  %v1079_v52 = vmul.f32 %v2655_v18, %v599_v46  ;;  %v1141_v53 = vmul.f32 %v2655_v18, %v909_v48  ;;  %v1632_v62 = vld [vmem:[#allocation2 + $0x273] ss:$13 sm:$0xff]  ;;  %v2241_v6 = vpop.f32.mrb[36].mxu0  ;;  %v2334_v7 = vpop.f32.mrb[36].mxu1 }
 0x144   : > { %1510 = vst [vmem:[#allocation2 + $0x2e0] sm:$0xff] %v1388_v37  ;;  %1450 = vst [vmem:[#allocation2 + $0x100] sm:$0xff] %v1328_v38  ;;  %v1209_v55 = vadd.f32 %v2660_v20, %v1080_v44  ;;  %v1271_v56 = vadd.f32 %v2660_v20, %v1142_v47  ;;  %v1670_v57 = vmax.f32 %v1640_v49, %v1652_v54  ;;  %v1390_v0 = vmax.f32 %v1268_v45, 0.0  ;;  %v609_v11 = vpop.f32.mrb[37].mxu0  ;;  %v919_v13 = vpop.f32.mrb[37].mxu1 }
 0x145   : > { %1513 = vst [vmem:[#allocation2 + $0x2f8] sm:$0xff] %v1391_v39  ;;  %v1615_v58 = vmax.f32 %v1585_v50, %v1602_v51  ;;  %v1208_v59 = vadd.f32 %v2660_v20, %v1079_v52  ;;  %v1270_v60 = vadd.f32 %v2660_v20, %v1141_v53  ;;  %v1082_v9 = vmul.f32 %v2241_v6, %v2655_v18  ;;  %v1692_v23 = vld [vmem:[#allocation2 + $0x275] ss:$13 sm:$0xff]  ;;  %v1802_v44 = vld [vmem:[#allocation2 + $0x71] ss:$13 sm:$0xff] }
 0x146   : > { %v1331_v63 = vmax.f32 %v1209_v55, 0.0  ;;  %v1700_v2 = vmax.f32 %v1670_v57, %v1682_v61  ;;  %v1393_v5 = vmax.f32 %v1271_v56, 0.0  ;;  %1512 = vst [vmem:[#allocation2 + $0x2f0] sm:$0xff] %v1390_v0  ;;  %v1144_v12 = vmul.f32 %v2334_v7, %v2655_v18  ;;  %v1772_v30 = vld [vmem:[#allocation2 + $0x70] ss:$13 sm:$0xff] }
 0x147   : > { %v1645_v3 = vmax.f32 %v1615_v58, %v1632_v62  ;;  %v1330_v4 = vmax.f32 %v1208_v59, 0.0  ;;  %v1392_v10 = vmax.f32 %v1270_v60, 0.0  ;;  %v1081_v16 = vmul.f32 %v2655_v18, %v609_v11  ;;  %v2244_v17 = vpop.f32.mrb[38].mxu0  ;;  %v2337_v21 = vpop.f32.mrb[38].mxu1  ;;  %v1722_v37 = vld [vmem:[#allocation2 + $0x276] ss:$13 sm:$0xff] }
 0x148   : > { %1453 = vst [vmem:[#allocation2 + $0x118] sm:$0xff] %v1331_v63  ;;  %v1730_v14 = vmax.f32 %v1700_v2, %v1712_v1  ;;  %1515 = vst [vmem:[#allocation2 + $0x308] sm:$0xff] %v1393_v5  ;;  %v1143_v19 = vmul.f32 %v2655_v18, %v919_v13  ;;  %v1211_v24 = vadd.f32 %v2660_v20, %v1082_v9  ;;  %v619_v27 = vpop.f32.mrb[39].mxu0  ;;  %v929_v29 = vpop.f32.mrb[39].mxu1  ;;  %v1752_v51 = vld [vmem:[#allocation2 + $0x277] ss:$13 sm:$0xff] }
 0x149   : > { %v1675_v15 = vmax.f32 %v1645_v3, %v1662_v8  ;;  %1452 = vst [vmem:[#allocation2 + $0x110] sm:$0xff] %v1330_v4  ;;  %1514 = vst [vmem:[#allocation2 + $0x300] sm:$0xff] %v1392_v10  ;;  %v1273_v25 = vadd.f32 %v2660_v20, %v1144_v12  ;;  %v1084_v26 = vmul.f32 %v2244_v17, %v2655_v18  ;;  %v1832_v62 = vld [vmem:[#allocation2 + $0x72] ss:$13 sm:$0xff] }
 0x14a   : > { %v1146_v28 = vmul.f32 %v2337_v21, %v2655_v18  ;;  %v1760_v31 = vmax.f32 %v1730_v14, %v1742_v22  ;;  %v1210_v33 = vadd.f32 %v2660_v20, %v1081_v16  ;;  %v1272_v34 = vadd.f32 %v2660_v20, %v1143_v19  ;;  %v1782_v63 = vld [vmem:[#allocation2 + $0x278] ss:$13 sm:$0xff]  ;;  %v2846_v13 = vld [vmem:[%s2970_s3] ss:$0 sm:$0xff] }
 0x14b   : > { %v1705_v32 = vmax.f32 %v1675_v15, %v1692_v23  ;;  %v2247_v35 = vpop.f32.mrb[40].mxu0  ;;  %v2340_v36 = vpop.f32.mrb[40].mxu1  ;;  %v1333_v38 = vmax.f32 %v1211_v24, 0.0  ;;  %v1395_v39 = vmax.f32 %v1273_v25, 0.0  ;;  %v1213_v40 = vadd.f32 %v2660_v20, %v1084_v26  ;;  %v1862_v5 = vld [vmem:[#allocation2 + $0x73] ss:$13 sm:$0xff] }
 0x14c   : > { %v1083_v41 = vmul.f32 %v2655_v18, %v619_v27  ;;  %v629_v42 = vpop.f32.mrb[41].mxu0  ;;  %v939_v43 = vpop.f32.mrb[41].mxu1  ;;  %v1790_v45 = vmax.f32 %v1760_v31, %v1772_v30  ;;  %v1332_v47 = vmax.f32 %v1210_v33, 0.0  ;;  %v1394_v48 = vmax.f32 %v1272_v34, 0.0  ;;  %v1812_v11 = vld [vmem:[#allocation2 + $0x279] ss:$13 sm:$0xff] }
 0x14d   : > { %v1735_v46 = vmax.f32 %v1705_v32, %v1722_v37  ;;  %1455 = vst [vmem:[#allocation2 + $0x128] sm:$0xff] %v1333_v38  ;;  %1517 = vst [vmem:[#allocation2 + $0x318] sm:$0xff] %v1395_v39  ;;  %v1335_v52 = vmax.f32 %v1213_v40, 0.0  ;;  %v1275_v54 = vadd.f32 %v2660_v20, %v1146_v28  ;;  %v1145_v55 = vmul.f32 %v2655_v18, %v929_v29  ;;  %v2852_v14 = vld [vmem:[%s2969_s2] ss:$0 sm:$0xff]  ;;  %v1920_v25 = vld [vmem:[%s2971_s4 + $0x8] sm:$0xff] }
 0x14e   : > { %v1212_v53 = vadd.f32 %v2660_v20, %v1083_v41  ;;  %v1820_v58 = vmax.f32 %v1790_v45, %v1802_v44  ;;  %1454 = vst [vmem:[#allocation2 + $0x120] sm:$0xff] %v1332_v47  ;;  %1516 = vst [vmem:[#allocation2 + $0x310] sm:$0xff] %v1394_v48  ;;  %v1086_v60 = vmul.f32 %v2247_v35, %v2655_v18  ;;  %v1892_v24 = vld [vmem:[#allocation2 + $0x74] ss:$13 sm:$0xff] }
 0x14f   : > { %v2250_v49 = vpop.f32.mrb[42].mxu0  ;;  %v2343_v50 = vpop.f32.mrb[42].mxu1  ;;  %v1765_v59 = vmax.f32 %v1735_v46, %v1752_v51  ;;  %v1148_v61 = vmul.f32 %v2340_v36, %v2655_v18  ;;  %1457 = vst [vmem:[#allocation2 + $0x138] sm:$0xff] %v1335_v52  ;;  %v1397_v1 = vmax.f32 %v1275_v54, 0.0  ;;  %v1274_v2 = vadd.f32 %v2660_v20, %v1145_v55  ;;  %v1842_v26 = vld [vmem:[#allocation2 + $0x27a] ss:$13 sm:$0xff] }
 0x150   : > { %v639_v56 = vpop.f32.mrb[43].mxu0  ;;  %v949_v57 = vpop.f32.mrb[43].mxu1  ;;  %v1334_v0 = vmax.f32 %v1212_v53, 0.0  ;;  %v1085_v3 = vmul.f32 %v2655_v18, %v629_v42  ;;  %v1850_v4 = vmax.f32 %v1820_v58, %v1832_v62  ;;  %v1215_v7 = vadd.f32 %v2660_v20, %v1086_v60  ;;  %v1872_v39 = vld [vmem:[#allocation2 + $0x27b] ss:$13 sm:$0xff] }
 0x151   : > { %v1795_v6 = vmax.f32 %v1765_v59, %v1782_v63  ;;  %v1277_v8 = vadd.f32 %v2660_v20, %v1148_v61  ;;  %1519 = vst [vmem:[#allocation2 + $0x328] sm:$0xff] %v1397_v1  ;;  %v1396_v12 = vmax.f32 %v1274_v2, 0.0  ;;  %v1147_v20 = vmul.f32 %v2852_v14, %v939_v43  ;;  %v1902_v51 = vld [vmem:[#allocation2 + $0x27c] ss:$13 sm:$0xff] }
 0x152   : > { %1456 = vst [vmem:[#allocation2 + $0x130] sm:$0xff] %v1334_v0  ;;  %v1214_v18 = vadd.f32 %v2846_v13, %v1085_v3  ;;  %v1088_v15 = vmul.f32 %v2852_v14, %v2250_v49  ;;  %v1880_v19 = vmax.f32 %v1850_v4, %v1862_v5  ;;  %v1337_v22 = vmax.f32 %v1215_v7, 0.0  ;;  %v1925_v52 = vld [vmem:[%s2971_s4 + $0x30] sm:$0xff] }
 0x153   : > { %v2253_v9 = vpop.f32.mrb[44].mxu0  ;;  %v2346_v10 = vpop.f32.mrb[44].mxu1  ;;  %v1825_v21 = vmax.f32 %v1795_v6, %v1812_v11  ;;  %v1399_v23 = vmax.f32 %v1277_v8, 0.0  ;;  %1518 = vst [vmem:[#allocation2 + $0x320] sm:$0xff] %v1396_v12  ;;  %v1276_v28 = vadd.f32 %v2846_v13, %v1147_v20  ;;  %v1087_v30 = vmul.f32 %v2852_v14, %v639_v56 }
 0x154   : > { %v649_v16 = vpop.f32.mrb[45].mxu0  ;;  %v959_v17 = vpop.f32.mrb[45].mxu1  ;;  %v1336_v27 = vmax.f32 %v1214_v18, 0.0  ;;  %v1217_v29 = vadd.f32 %v2846_v13, %v1088_v15  ;;  %v1910_v31 = vmax.f32 %v1880_v19, %v1892_v24  ;;  %v1544_v33 = vld [vmem:[#allocation2 + $0xd0] ss:$13 sm:$0xff]  ;;  %1459 = vst [vmem:[#allocation2 + $0x148] sm:$0xff] %v1337_v22  ;;  %v1150_v35 = vmul.f32 %v2852_v14, %v2343_v50 }
 0x155   : > { %v1855_v32 = vmax.f32 %v1825_v21, %v1842_v26  ;;  %v1564_v34 = vld [vmem:[#allocation2 + $0xd1] ss:$13 sm:$0xff]  ;;  %1521 = vst [vmem:[#allocation2 + $0x338] sm:$0xff] %v1399_v23  ;;  %v1090_v36 = vmul.f32 %v2852_v14, %v2253_v9  ;;  %v1216_v42 = vadd.f32 %v2846_v13, %v1087_v30  ;;  %v1149_v43 = vmul.f32 %v2852_v14, %v949_v57  ;;  %v1624_v58 = vld [vmem:[#allocation2 + $0xd3] ss:$13 sm:$0xff] }
 0x156   : > { %v1581_v40 = vmax.f32 %v1544_v33, %v1564_v34  ;;  %v1594_v41 = vld [vmem:[#allocation2 + $0xd2] ss:$13 sm:$0xff]  ;;  %1458 = vst [vmem:[#allocation2 + $0x140] sm:$0xff] %v1336_v27  ;;  %v1089_v44 = vmul.f32 %v2852_v14, %v649_v16  ;;  %v1930_v45 = vadd.f32 %v1920_v25, %v1910_v31  ;;  %v1398_v47 = vmax.f32 %v1276_v28, 0.0  ;;  %v1654_v3 = vld [vmem:[#allocation2 + $0xd4] ss:$13 sm:$0xff] }
 0x157   : > { %v2256_v37 = vpop.f32.mrb[46].mxu0  ;;  %v2349_v38 = vpop.f32.mrb[46].mxu1  ;;  %v1885_v46 = vmax.f32 %v1855_v32, %v1872_v39  ;;  %v1339_v48 = vmax.f32 %v1217_v29, 0.0  ;;  %v1338_v54 = vmax.f32 %v1216_v42, 0.0  ;;  %v1279_v55 = vadd.f32 %v2846_v13, %v1150_v35 }
 0x158   : > { %v659_v49 = vpop.f32.mrb[47].mxu0  ;;  %v969_v50 = vpop.f32.mrb[47].mxu1  ;;  %v1611_v53 = vmax.f32 %v1581_v40, %v1594_v41  ;;  %v1219_v56 = vadd.f32 %v2846_v13, %v1090_v36  ;;  %1940 = vst [vmem:[%s2775_s17 + $0x8] sm:$0xff] %v1930_v45  ;;  %1520 = vst [vmem:[#allocation2 + $0x330] sm:$0xff] %v1398_v47  ;;  %v1278_v59 = vadd.f32 %v2846_v13, %v1149_v43 }
 0x159   : > { %v1915_v57 = vmax.f32 %v1885_v46, %v1902_v51  ;;  %1461 = vst [vmem:[#allocation2 + $0x158] sm:$0xff] %v1339_v48  ;;  %v1218_v60 = vadd.f32 %v2846_v13, %v1089_v44  ;;  %v1152_v61 = vmul.f32 %v2852_v14, %v2346_v10  ;;  %1460 = vst [vmem:[#allocation2 + $0x150] sm:$0xff] %v1338_v54  ;;  %v1401_v4 = vmax.f32 %v1279_v55, 0.0  ;;  %v1684_v11 = vld [vmem:[#allocation2 + $0xd5] ss:$13 sm:$0xff] }
 0x15a   : > { %v1641_v62 = vmax.f32 %v1611_v53, %v1624_v58  ;;  %v1092_v63 = vmul.f32 %v2852_v14, %v2256_v37  ;;  %v1151_v0 = vmul.f32 %v2852_v14, %v959_v17  ;;  %v1091_v1 = vmul.f32 %v2852_v14, %v659_v49  ;;  %v1714_v24 = vld [vmem:[#allocation2 + $0xd6] ss:$13 sm:$0xff]  ;;  %v1774_v45 = vld [vmem:[#allocation2 + $0xd8] ss:$13 sm:$0xff] }
 0x15b   : > { %v1935_v2 = vadd.f32 %v1925_v52, %v1915_v57  ;;  %v1341_v5 = vmax.f32 %v1219_v56, 0.0  ;;  %v1281_v6 = vadd.f32 %v2846_v13, %v1152_v61  ;;  %1523 = vst [vmem:[#allocation2 + $0x348] sm:$0xff] %v1401_v4  ;;  %v1400_v12 = vmax.f32 %v1278_v59, 0.0  ;;  %v2259_v22 = vpop.f32.mrb[48].mxu0  ;;  %v2352_v23 = vpop.f32.mrb[48].mxu1 }
 0x15c   : > { %v1671_v7 = vmax.f32 %v1641_v62, %v1654_v3  ;;  %v1221_v8 = vadd.f32 %v2846_v13, %v1092_v63  ;;  %v1280_v9 = vadd.f32 %v2846_v13, %v1151_v0  ;;  %v1220_v10 = vadd.f32 %v2846_v13, %v1091_v1  ;;  %v669_v29 = vpop.f32.mrb[49].mxu0  ;;  %v979_v30 = vpop.f32.mrb[49].mxu1  ;;  %v1744_v37 = vld [vmem:[#allocation2 + $0xd7] ss:$13 sm:$0xff]  ;;  %v1804_v59 = vld [vmem:[#allocation2 + $0xd9] ss:$13 sm:$0xff] }
 0x15d   : > { %1945 = vst [vmem:[%s2775_s17 + $0x30] sm:$0xff] %v1935_v2  ;;  %1463 = vst [vmem:[#allocation2 + $0x168] sm:$0xff] %v1341_v5  ;;  %v1340_v18 = vmax.f32 %v1218_v60, 0.0  ;;  %v1154_v20 = vmul.f32 %v2852_v14, %v2349_v38  ;;  %v1153_v15 = vmul.f32 %v2852_v14, %v969_v50  ;;  %v1403_v17 = vmax.f32 %v1281_v6, 0.0 }
 0x15e   : > { %v1701_v16 = vmax.f32 %v1671_v7, %v1684_v11  ;;  %v1343_v19 = vmax.f32 %v1221_v8, 0.0  ;;  %v1402_v21 = vmax.f32 %v1280_v9, 0.0  ;;  %1522 = vst [vmem:[#allocation2 + $0x340] sm:$0xff] %v1400_v12  ;;  %v1342_v25 = vmax.f32 %v1220_v10, 0.0  ;;  %v1834_v9 = vld [vmem:[#allocation2 + $0xda] ss:$13 sm:$0xff] }
 0x15f   : > { %1462 = vst [vmem:[#allocation2 + $0x160] sm:$0xff] %v1340_v18  ;;  %v1283_v26 = vadd.f32 %v2846_v13, %v1154_v20  ;;  %v1094_v27 = vmul.f32 %v2852_v14, %v2259_v22  ;;  %v1282_v28 = vadd.f32 %v2846_v13, %v1153_v15  ;;  %v1554_v32 = vld [vmem:[#allocation2 + $0x2d8] ss:$13 sm:$0xff]  ;;  %1525 = vst [vmem:[#allocation2 + $0x358] sm:$0xff] %v1403_v17  ;;  %v1604_v41 = vld [vmem:[#allocation2 + $0x2da] ss:$13 sm:$0xff] }
 0x160   : > { %v1731_v31 = vmax.f32 %v1701_v16, %v1714_v24  ;;  %v1574_v33 = vld [vmem:[#allocation2 + $0x2d9] ss:$13 sm:$0xff]  ;;  %1465 = vst [vmem:[#allocation2 + $0x178] sm:$0xff] %v1343_v19  ;;  %1524 = vst [vmem:[#allocation2 + $0x350] sm:$0xff] %v1402_v21  ;;  %v1093_v34 = vmul.f32 %v2852_v14, %v669_v29  ;;  %v1156_v35 = vmul.f32 %v2852_v14, %v2352_v23  ;;  %v2262_v49 = vpop.f32.mrb[50].mxu0  ;;  %v2355_v51 = vpop.f32.mrb[50].mxu1 }
 0x161   : > { %v1155_v36 = vmul.f32 %v2852_v14, %v979_v30  ;;  %v1586_v38 = vmax.f32 %v1554_v32, %v1574_v33  ;;  %1464 = vst [vmem:[#allocation2 + $0x170] sm:$0xff] %v1342_v25  ;;  %v1223_v39 = vadd.f32 %v2846_v13, %v1094_v27  ;;  %v1405_v42 = vmax.f32 %v1283_v26, 0.0  ;;  %v1634_v53 = vld [vmem:[#allocation2 + $0x2db] ss:$13 sm:$0xff]  ;;  %v679_v56 = vpop.f32.mrb[51].mxu0  ;;  %v989_v58 = vpop.f32.mrb[51].mxu1 }
 0x162   : > { %v1761_v40 = vmax.f32 %v1731_v31, %v1744_v37  ;;  %v1404_v43 = vmax.f32 %v1282_v28, 0.0  ;;  %v1222_v44 = vadd.f32 %v2846_v13, %v1093_v34  ;;  %v1285_v48 = vadd.f32 %v2846_v13, %v1156_v35  ;;  %v1664_v3 = vld [vmem:[#allocation2 + $0x2dc] ss:$13 sm:$0xff]  ;;  %v1724_v33 = vld [vmem:[#allocation2 + $0x2de] ss:$13 sm:$0xff] }
 0x163   : > { %v1616_v46 = vmax.f32 %v1586_v38, %v1604_v41  ;;  %v1345_v47 = vmax.f32 %v1223_v39, 0.0  ;;  %v1284_v50 = vadd.f32 %v2846_v13, %v1155_v36  ;;  %1527 = vst [vmem:[#allocation2 + $0x368] sm:$0xff] %v1405_v42  ;;  %v1096_v55 = vmul.f32 %v2852_v14, %v2262_v49  ;;  %v2265_v0 = vpop.f32.mrb[52].mxu0  ;;  %v2358_v1 = vpop.f32.mrb[52].mxu1  ;;  %v1694_v17 = vld [vmem:[#allocation2 + $0x2dd] ss:$13 sm:$0xff] }
 0x164   : > { %v1791_v52 = vmax.f32 %v1761_v40, %v1774_v45  ;;  %1526 = vst [vmem:[#allocation2 + $0x360] sm:$0xff] %v1404_v43  ;;  %v1344_v54 = vmax.f32 %v1222_v44, 0.0  ;;  %v1158_v57 = vmul.f32 %v2852_v14, %v2355_v51  ;;  %v1407_v61 = vmax.f32 %v1285_v48, 0.0  ;;  %v689_v7 = vpop.f32.mrb[53].mxu0  ;;  %v999_v8 = vpop.f32.mrb[53].mxu1  ;;  %v1921_v40 = vld [vmem:[%s2971_s4 + $0x10] sm:$0xff] }
 0x165   : > { %v1646_v60 = vmax.f32 %v1616_v46, %v1634_v53  ;;  %1467 = vst [vmem:[#allocation2 + $0x188] sm:$0xff] %v1345_v47  ;;  %v1406_v62 = vmax.f32 %v1284_v50, 0.0  ;;  %v1095_v63 = vmul.f32 %v2852_v14, %v679_v56  ;;  %v1225_v4 = vadd.f32 %v2846_v13, %v1096_v55  ;;  %v1864_v25 = vld [vmem:[#allocation2 + $0xdb] ss:$13 sm:$0xff]  ;;  %v1754_v46 = vld [vmem:[#allocation2 + $0x2df] ss:$13 sm:$0xff] }
 0x166   : > { %v1821_v2 = vmax.f32 %v1791_v52, %v1804_v59  ;;  %1466 = vst [vmem:[#allocation2 + $0x180] sm:$0xff] %v1344_v54  ;;  %v1287_v5 = vadd.f32 %v2846_v13, %v1158_v57  ;;  %v1157_v6 = vmul.f32 %v2852_v14, %v989_v58  ;;  %1529 = vst [vmem:[#allocation2 + $0x378] sm:$0xff] %v1407_v61  ;;  %v1894_v39 = vld [vmem:[#allocation2 + $0xdc] ss:$13 sm:$0xff]  ;;  %v1784_v57 = vld [vmem:[#allocation2 + $0x2e0] ss:$13 sm:$0xff] }
 0x167   : > { %v1676_v10 = vmax.f32 %v1646_v60, %v1664_v3  ;;  %1528 = vst [vmem:[#allocation2 + $0x370] sm:$0xff] %v1406_v62  ;;  %v1224_v11 = vadd.f32 %v2846_v13, %v1095_v63  ;;  %v1098_v12 = vmul.f32 %v2852_v14, %v2265_v0  ;;  %v1160_v18 = vmul.f32 %v2852_v14, %v2358_v1  ;;  %v2268_v20 = vpop.f32.mrb[54].mxu0  ;;  %v2361_v15 = vpop.f32.mrb[54].mxu1  ;;  %v1814_v1 = vld [vmem:[#allocation2 + $0x2e1] ss:$13 sm:$0xff] }
 0x168   : > { %v1851_v16 = vmax.f32 %v1821_v2, %v1834_v9  ;;  %v1347_v19 = vmax.f32 %v1225_v4, 0.0  ;;  %v1409_v21 = vmax.f32 %v1287_v5, 0.0  ;;  %v1286_v22 = vadd.f32 %v2846_v13, %v1157_v6  ;;  %v699_v23 = vpop.f32.mrb[55].mxu0  ;;  %v1009_v24 = vpop.f32.mrb[55].mxu1 }
 0x169   : > { %v1706_v26 = vmax.f32 %v1676_v10, %v1694_v17  ;;  %v1346_v27 = vmax.f32 %v1224_v11, 0.0  ;;  %v1227_v28 = vadd.f32 %v2846_v13, %v1098_v12  ;;  %v1289_v29 = vadd.f32 %v2846_v13, %v1160_v18  ;;  %v1844_v10 = vld [vmem:[#allocation2 + $0x2e2] ss:$13 sm:$0xff] }
 0x16a   : > { %v1881_v32 = vmax.f32 %v1851_v16, %v1864_v25  ;;  %1469 = vst [vmem:[#allocation2 + $0x198] sm:$0xff] %v1347_v19  ;;  %1531 = vst [vmem:[#allocation2 + $0x388] sm:$0xff] %v1409_v21  ;;  %v1408_v34 = vmax.f32 %v1286_v22, 0.0  ;;  %v1097_v35 = vmul.f32 %v2852_v14, %v689_v7  ;;  %v1159_v36 = vmul.f32 %v2852_v14, %v999_v8  ;;  %v1874_v21 = vld [vmem:[#allocation2 + $0x2e3] ss:$13 sm:$0xff] }
 0x16b   : > { %v2271_v30 = vpop.f32.mrb[56].mxu0  ;;  %v2364_v31 = vpop.f32.mrb[56].mxu1  ;;  %v1736_v41 = vmax.f32 %v1706_v26, %v1724_v33  ;;  %1468 = vst [vmem:[#allocation2 + $0x190] sm:$0xff] %v1346_v27  ;;  %v1349_v42 = vmax.f32 %v1227_v28, 0.0  ;;  %v1411_v43 = vmax.f32 %v1289_v29, 0.0  ;;  %v1100_v44 = vmul.f32 %v2852_v14, %v2268_v20 }
 0x16c   : > { %v709_v37 = vpop.f32.mrb[57].mxu0  ;;  %v1019_v38 = vpop.f32.mrb[57].mxu1  ;;  %v1911_v45 = vmax.f32 %v1881_v32, %v1894_v39  ;;  %1530 = vst [vmem:[#allocation2 + $0x380] sm:$0xff] %v1408_v34  ;;  %v1226_v47 = vadd.f32 %v2846_v13, %v1097_v35  ;;  %v1288_v48 = vadd.f32 %v2846_v13, %v1159_v36  ;;  %v1162_v49 = vmul.f32 %v2852_v14, %v2361_v15  ;;  %v1904_v33 = vld [vmem:[#allocation2 + $0x2e4] ss:$13 sm:$0xff] }
 0x16d   : > { %v1766_v50 = vmax.f32 %v1736_v41, %v1754_v46  ;;  %1471 = vst [vmem:[#allocation2 + $0x1a8] sm:$0xff] %v1349_v42  ;;  %1533 = vst [vmem:[#allocation2 + $0x398] sm:$0xff] %v1411_v43  ;;  %v1229_v51 = vadd.f32 %v2846_v13, %v1100_v44  ;;  %v1099_v52 = vmul.f32 %v2852_v14, %v699_v23  ;;  %v1926_v34 = vld [vmem:[%s2971_s4 + $0x38] sm:$0xff] }
 0x16e   : > { %v1161_v53 = vmul.f32 %v2852_v14, %v1009_v24  ;;  %v1931_v56 = vadd.f32 %v1921_v40, %v1911_v45  ;;  %v1348_v58 = vmax.f32 %v1226_v47, 0.0  ;;  %v1410_v59 = vmax.f32 %v1288_v48, 0.0 }
 0x16f   : > { %v2274_v54 = vpop.f32.mrb[58].mxu0  ;;  %v2367_v55 = vpop.f32.mrb[58].mxu1  ;;  %v1291_v60 = vadd.f32 %v2846_v13, %v1162_v49  ;;  %v1796_v63 = vmax.f32 %v1766_v50, %v1784_v57  ;;  %v1351_v0 = vmax.f32 %v1229_v51, 0.0  ;;  %v1102_v3 = vmul.f32 %v2852_v14, %v2271_v30 }
 0x170   : > { %v719_v61 = vpop.f32.mrb[59].mxu0  ;;  %v1029_v62 = vpop.f32.mrb[59].mxu1  ;;  %1941 = vst [vmem:[%s2775_s17 + $0x10] sm:$0xff] %v1931_v56  ;;  %1470 = vst [vmem:[#allocation2 + $0x1a0] sm:$0xff] %v1348_v58  ;;  %v1101_v4 = vmul.f32 %v2852_v14, %v709_v37  ;;  %v1164_v5 = vmul.f32 %v2852_v14, %v2364_v31  ;;  %v1163_v7 = vmul.f32 %v2852_v14, %v1019_v38 }
 0x171   : > { %1532 = vst [vmem:[#allocation2 + $0x390] sm:$0xff] %v1410_v59  ;;  %v1413_v2 = vmax.f32 %v1291_v60, 0.0  ;;  %v1826_v6 = vmax.f32 %v1796_v63, %v1814_v1  ;;  %1473 = vst [vmem:[#allocation2 + $0x1b8] sm:$0xff] %v1351_v0  ;;  %v1104_v8 = vmul.f32 %v2852_v14, %v2274_v54  ;;  %v1166_v9 = vmul.f32 %v2852_v14, %v2367_v55  ;;  %v1686_v60 = vld [vmem:[#allocation2 + $0x13d] ss:$13 sm:$0xff] }
 0x172   : > { %v1546_v11 = vld [vmem:[#allocation2 + $0x138] ss:$13 sm:$0xff]  ;;  %v1228_v12 = vadd.f32 %v2846_v13, %v1099_v52  ;;  %v1290_v18 = vadd.f32 %v2846_v13, %v1161_v53  ;;  %v1103_v20 = vmul.f32 %v2852_v14, %v719_v61  ;;  %v1231_v17 = vadd.f32 %v2846_v13, %v1102_v3  ;;  %v1596_v27 = vld [vmem:[#allocation2 + $0x13a] ss:$13 sm:$0xff]  ;;  %v1656_v46 = vld [vmem:[#allocation2 + $0x13c] ss:$13 sm:$0xff] }
 0x173   : > { %1535 = vst [vmem:[#allocation2 + $0x3a8] sm:$0xff] %v1413_v2  ;;  %v1856_v15 = vmax.f32 %v1826_v6, %v1844_v10  ;;  %v1566_v16 = vld [vmem:[#allocation2 + $0x139] ss:$13 sm:$0xff]  ;;  %v1230_v19 = vadd.f32 %v2846_v13, %v1101_v4  ;;  %v1293_v23 = vadd.f32 %v2846_v13, %v1164_v5  ;;  %v1292_v24 = vadd.f32 %v2846_v13, %v1163_v7  ;;  %v2277_v39 = vpop.f32.mrb[60].mxu0  ;;  %v1626_v41 = vld [vmem:[#allocation2 + $0x13b] ss:$13 sm:$0xff] }
 0x174   : > { %v1582_v22 = vmax.f32 %v1546_v11, %v1566_v16  ;;  %v1165_v25 = vmul.f32 %v2852_v14, %v1029_v62  ;;  %v1556_v28 = vld [vmem:[#allocation2 + $0x340] ss:$13 sm:$0xff]  ;;  %v1233_v30 = vadd.f32 %v2846_v13, %v1104_v8  ;;  %v1295_v31 = vadd.f32 %v2846_v13, %v1166_v9  ;;  %v729_v50 = vpop.f32.mrb[61].mxu0  ;;  %v1716_v3 = vld [vmem:[#allocation2 + $0x13e] ss:$13 sm:$0xff] }
 0x175   : > { %v1886_v26 = vmax.f32 %v1856_v15, %v1874_v21  ;;  %v1576_v29 = vld [vmem:[#allocation2 + $0x341] ss:$13 sm:$0xff]  ;;  %v1232_v32 = vadd.f32 %v2846_v13, %v1103_v20  ;;  %v1350_v37 = vmax.f32 %v1228_v12, 0.0  ;;  %v1412_v38 = vmax.f32 %v1290_v18, 0.0  ;;  %v1746_v7 = vld [vmem:[#allocation2 + $0x13f] ss:$13 sm:$0xff] }
 0x176   : > { %v1612_v35 = vmax.f32 %v1582_v22, %v1596_v27  ;;  %v1587_v36 = vmax.f32 %v1556_v28, %v1576_v29  ;;  %v1294_v43 = vadd.f32 %v2846_v13, %v1165_v25  ;;  %v1106_v44 = vmul.f32 %v2852_v14, %v2277_v39  ;;  %v1776_v11 = vld [vmem:[#allocation2 + $0x140] ss:$13 sm:$0xff] }
 0x177   : > { %v1916_v40 = vmax.f32 %v1886_v26, %v1904_v33  ;;  %1472 = vst [vmem:[#allocation2 + $0x1b0] sm:$0xff] %v1350_v37  ;;  %1534 = vst [vmem:[#allocation2 + $0x3a0] sm:$0xff] %v1412_v38  ;;  %v1353_v48 = vmax.f32 %v1231_v17, 0.0  ;;  %v1352_v49 = vmax.f32 %v1230_v19, 0.0  ;;  %v1415_v53 = vmax.f32 %v1293_v23, 0.0  ;;  %v1922_v33 = vld [vmem:[%s2971_s4 + $0x18] sm:$0xff] }
 0x178   : > { %v1606_v42 = vld [vmem:[#allocation2 + $0x342] ss:$13 sm:$0xff]  ;;  %v1642_v45 = vmax.f32 %v1612_v35, %v1626_v41  ;;  %v1414_v54 = vmax.f32 %v1292_v24, 0.0  ;;  %v1355_v55 = vmax.f32 %v1233_v30, 0.0  ;;  %v1417_v58 = vmax.f32 %v1295_v31, 0.0 }
 0x179   : > { %v1617_v47 = vmax.f32 %v1587_v36, %v1606_v42  ;;  %v1936_v51 = vadd.f32 %v1926_v34, %v1916_v40  ;;  %v1636_v52 = vld [vmem:[#allocation2 + $0x343] ss:$13 sm:$0xff]  ;;  %1475 = vst [vmem:[#allocation2 + $0x1c8] sm:$0xff] %v1353_v48  ;;  %1474 = vst [vmem:[#allocation2 + $0x1c0] sm:$0xff] %v1352_v49  ;;  %v1354_v59 = vmax.f32 %v1232_v32, 0.0  ;;  %v1416_v62 = vmax.f32 %v1294_v43, 0.0 }
 0x17a   : > { %v1672_v56 = vmax.f32 %v1642_v45, %v1656_v46  ;;  %v1666_v61 = vld [vmem:[#allocation2 + $0x344] ss:$13 sm:$0xff]  ;;  %1537 = vst [vmem:[#allocation2 + $0x3b8] sm:$0xff] %v1415_v53  ;;  %1536 = vst [vmem:[#allocation2 + $0x3b0] sm:$0xff] %v1414_v54  ;;  %v1235_v63 = vadd.f32 %v2846_v13, %v1106_v44  ;;  %v1105_v0 = vmul.f32 %v2852_v14, %v729_v50  ;;  %v1806_v15 = vld [vmem:[#allocation2 + $0x141] ss:$13 sm:$0xff] }
 0x17b   : > { %v1647_v57 = vmax.f32 %v1617_v47, %v1636_v52  ;;  %1946 = vst [vmem:[%s2775_s17 + $0x38] sm:$0xff] %v1936_v51  ;;  %1477 = vst [vmem:[#allocation2 + $0x1d8] sm:$0xff] %v1355_v55  ;;  %v1836_v19 = vld [vmem:[#allocation2 + $0x142] ss:$13 sm:$0xff]  ;;  %v1896_v32 = vld [vmem:[#allocation2 + $0x144] ss:$13 sm:$0xff] }
 0x17c   : > { %v1702_v1 = vmax.f32 %v1672_v56, %v1686_v60  ;;  %1539 = vst [vmem:[#allocation2 + $0x3c8] sm:$0x7f] %v1417_v58  ;;  %1476 = vst [vmem:[#allocation2 + $0x1d0] sm:$0xff] %v1354_v59  ;;  %v1357_v4 = vmax.f32 %v1235_v63, 0.0  ;;  %v1234_v5 = vadd.f32 %v2846_v13, %v1105_v0  ;;  %v1866_v26 = vld [vmem:[#allocation2 + $0x143] ss:$13 sm:$0xff] }
 0x17d   : > { %v1677_v2 = vmax.f32 %v1647_v57, %v1666_v61  ;;  %1538 = vst [vmem:[#allocation2 + $0x3c0] sm:$0xff] %v1416_v62  ;;  %v1927_v48 = vld [vmem:[%s2971_s4 + $0x40] sm:$0xff] }
 0x17e   : > { %v1732_v6 = vmax.f32 %v1702_v1, %v1716_v3  ;;  %v1696_v8 = vld [vmem:[#allocation2 + $0x345] ss:$13 sm:$0xff]  ;;  %1479 = vst [vmem:[#allocation2 + $0x1e8] sm:$0xff] %v1357_v4  ;;  %v1356_v18 = vmax.f32 %v1234_v5, 0.0  ;;  %v1756_v16 = vld [vmem:[#allocation2 + $0x347] ss:$13 sm:$0xff] }
 0x17f   : > { %v1707_v10 = vmax.f32 %v1677_v2, %v1696_v8  ;;  %v1726_v12 = vld [vmem:[#allocation2 + $0x346] ss:$13 sm:$0xff]  ;;  %v1786_v22 = vld [vmem:[#allocation2 + $0x348] ss:$13 sm:$0xff]  ;;  %v1846_v34 = vld [vmem:[#allocation2 + $0x34a] ss:$13 sm:$0xff] }
 0x180   : > { %v1762_v9 = vmax.f32 %v1732_v6, %v1746_v7  ;;  %1478 = vst [vmem:[#allocation2 + $0x1e0] sm:$0xff] %v1356_v18  ;;  %v1816_v27 = vld [vmem:[#allocation2 + $0x349] ss:$13 sm:$0xff]  ;;  %v1876_v39 = vld [vmem:[#allocation2 + $0x34b] ss:$13 sm:$0xff] }
 0x181   : > { %v1737_v14 = vmax.f32 %v1707_v10, %v1726_v12  ;;  %v1906_v47 = vld [vmem:[#allocation2 + $0x34c] ss:$13 sm:$0xff] }
 0x182   : > { %v1792_v20 = vmax.f32 %v1762_v9, %v1776_v11 }
 0x183   : > { %v1767_v21 = vmax.f32 %v1737_v14, %v1756_v16  ;;  %v1728_v57 = vld [vmem:[#allocation2 + $0x3ae] ss:$13 sm:$0x7]  ;;  %v1758_v61 = vld [vmem:[#allocation2 + $0x3af] ss:$13 sm:$0x7] }
 0x184   : > { %v1822_v17 = vmax.f32 %v1792_v20, %v1806_v15  ;;  %v1558_v23 = vld [vmem:[#allocation2 + $0x3a8] ss:$13 sm:$0x7]  ;;  %v1578_v25 = vld [vmem:[#allocation2 + $0x3a9] ss:$13 sm:$0x7] }
 0x185   : > { %v1797_v24 = vmax.f32 %v1767_v21, %v1786_v22  ;;  %v1588_v28 = vmax.f32 %v1558_v23, %v1578_v25  ;;  %v1608_v31 = vld [vmem:[#allocation2 + $0x3aa] ss:$13 sm:$0x7]  ;;  %v1638_v38 = vld [vmem:[#allocation2 + $0x3ab] ss:$13 sm:$0x7] }
 0x186   : > { %v1852_v13 = vmax.f32 %v1822_v17, %v1836_v19  ;;  %v1668_v45 = vld [vmem:[#allocation2 + $0x3ac] ss:$13 sm:$0x7]  ;;  %v1698_v52 = vld [vmem:[#allocation2 + $0x3ad] ss:$13 sm:$0x7] }
 0x187   : > { %v1827_v30 = vmax.f32 %v1797_v24, %v1816_v27  ;;  %v1618_v35 = vmax.f32 %v1588_v28, %v1608_v31  ;;  %v1548_v41 = vld [vmem:[#allocation2 + $0x1a0] ss:$13 sm:$0xff]  ;;  %v1598_v50 = vld [vmem:[#allocation2 + $0x1a2] ss:$13 sm:$0xff]  ;;  %v1658_v60 = vld [vmem:[#allocation2 + $0x1a4] ss:$13 sm:$0xff] }
 0x188   : > { %v1882_v29 = vmax.f32 %v1852_v13, %v1866_v26  ;;  %v1568_v42 = vld [vmem:[#allocation2 + $0x1a1] ss:$13 sm:$0xff]  ;;  %v1628_v55 = vld [vmem:[#allocation2 + $0x1a3] ss:$13 sm:$0xff]  ;;  %v1688_v0 = vld [vmem:[#allocation2 + $0x1a5] ss:$13 sm:$0xff] }
 0x189   : > { %v1857_v37 = vmax.f32 %v1827_v30, %v1846_v34  ;;  %v1648_v40 = vmax.f32 %v1618_v35, %v1638_v38  ;;  %v1583_v46 = vmax.f32 %v1548_v41, %v1568_v42  ;;  %v1788_v1 = vld [vmem:[#allocation2 + $0x3b0] ss:$13 sm:$0x7]  ;;  %v1718_v4 = vld [vmem:[#allocation2 + $0x1a6] ss:$13 sm:$0xff] }
 0x18a   : > { %v1912_v36 = vmax.f32 %v1882_v29, %v1896_v32  ;;  %v1818_v5 = vld [vmem:[#allocation2 + $0x3b1] ss:$13 sm:$0x7]  ;;  %v1748_v8 = vld [vmem:[#allocation2 + $0x1a7] ss:$13 sm:$0xff] }
 0x18b   : > { %v1887_v44 = vmax.f32 %v1857_v37, %v1876_v39  ;;  %v1678_v49 = vmax.f32 %v1648_v40, %v1668_v45  ;;  %v1613_v53 = vmax.f32 %v1583_v46, %v1598_v50  ;;  %v1848_v9 = vld [vmem:[#allocation2 + $0x3b2] ss:$13 sm:$0x7]  ;;  %v1778_v12 = vld [vmem:[#allocation2 + $0x1a8] ss:$13 sm:$0xff] }
 0x18c   : > { %v1932_v43 = vadd.f32 %v1922_v33, %v1912_v36  ;;  %v1878_v18 = vld [vmem:[#allocation2 + $0x3b3] ss:$13 sm:$0x7]  ;;  %v1808_v15 = vld [vmem:[#allocation2 + $0x1a9] ss:$13 sm:$0xff] }
 0x18d   : > { %v1917_v51 = vmax.f32 %v1887_v44, %v1906_v47  ;;  %v1708_v54 = vmax.f32 %v1678_v49, %v1698_v52  ;;  %v1643_v58 = vmax.f32 %v1613_v53, %v1628_v55  ;;  %v1908_v16 = vld [vmem:[#allocation2 + $0x3b4] ss:$13 sm:$0x7]  ;;  %v1928_v17 = vld [vmem:[%s2971_s4 + $0x48] sm:$0x7] }
 0x18e   : > { %1942 = vst [vmem:[%s2775_s17 + $0x18] sm:$0xff] %v1932_v43  ;;  %v1838_v22 = vld [vmem:[#allocation2 + $0x1aa] ss:$13 sm:$0xff]  ;;  %v1898_v26 = vld [vmem:[#allocation2 + $0x1ac] ss:$13 sm:$0xff] }
 0x18f   : > { %v1937_v56 = vadd.f32 %v1927_v48, %v1917_v51  ;;  %v1738_v59 = vmax.f32 %v1708_v54, %v1728_v57  ;;  %v1673_v62 = vmax.f32 %v1643_v58, %v1658_v60  ;;  %v1868_v24 = vld [vmem:[#allocation2 + $0x1ab] ss:$13 sm:$0xff] }
 0x190   : > { %v1923_v27 = vld [vmem:[%s2971_s4 + $0x20] sm:$0xff] }
 0x191   : > { %1947 = vst [vmem:[%s2775_s17 + $0x40] sm:$0xff] %v1937_v56  ;;  %v1768_v63 = vmax.f32 %v1738_v59, %v1758_v61  ;;  %v1703_v2 = vmax.f32 %v1673_v62, %v1688_v0 }
 0x193   : > { %v1798_v3 = vmax.f32 %v1768_v63, %v1788_v1  ;;  %v1733_v6 = vmax.f32 %v1703_v2, %v1718_v4 }
 0x195   : > { %v1828_v7 = vmax.f32 %v1798_v3, %v1818_v5  ;;  %v1763_v10 = vmax.f32 %v1733_v6, %v1748_v8 }
 0x197   : > { %v1858_v11 = vmax.f32 %v1828_v7, %v1848_v9  ;;  %v1793_v20 = vmax.f32 %v1763_v10, %v1778_v12 }
 0x199   : > { %v1888_v14 = vmax.f32 %v1858_v11, %v1878_v18  ;;  %v1823_v19 = vmax.f32 %v1793_v20, %v1808_v15 }
 0x19b   : > { %v1918_v21 = vmax.f32 %v1888_v14, %v1908_v16  ;;  %v1853_v23 = vmax.f32 %v1823_v19, %v1838_v22 }
 0x19d   : > { %v1938_v13 = vadd.f32 %v1928_v17, %v1918_v21  ;;  %v1883_v25 = vmax.f32 %v1853_v23, %v1868_v24 }
 0x19f   : > { %1948 = vst [vmem:[%s2775_s17 + $0x48] sm:$0x7] %v1938_v13  ;;  %v1913_v28 = vmax.f32 %v1883_v25, %v1898_v26 }
 0x1a1   : > { %v1933_v29 = vadd.f32 %v1923_v27, %v1913_v28 }
 0x1a3   : > { %1943 = vst [vmem:[%s2775_s17 + $0x20] sm:$0xff] %v1933_v29 }
 0x1a4 PF: > { %s15_s18 = sadd.s32 1, %s2434_s18  }
 0x1a5   : > { %p12_p4 = scmp.ge.s32.totalorder %s15_s18, 4  }
 0x1a7   :  { %14 = sbr.rel (!%p12_p4) target bundleno = 1 (0x1), region = 199 }

</bundles_post_ra>
